<compile_context>
chip_gen: v7x
topology: tpu7x:2x2x1
jax: 0.10.0
libtpu: 0.0.40
codegen_flags: <defaults>
</compile_context>

<pallas_src>
import functools

import jax
import jax.numpy as jnp
from jax.experimental import pallas as pl
from jax.experimental.pallas import tpu as pltpu

LANE = 128


# --------------------------------------------------------------------------
# Fused kernel: (conv+bn+relu) x3 -> avg-pool -> fc
# --------------------------------------------------------------------------
def _fused_fcn_kernel(x_ref, w1_ref, s1_ref, w2_ref, s2_ref, w3_ref, s3_ref,
                      wfc_ref, bfc_ref, o_ref, *, c0, k1, k2, k3):
    B = x_ref.shape[0]
    T0 = x_ref.shape[1] // c0
    T1 = T0 - k1 + 1
    T2 = T1 - k2 + 1
    T3 = T2 - k3 + 1
    cdt = w1_ref.dtype            # MXU operand dtype (bf16 fast path / f32); f32 acc

    # ---- block1: the flattened (time-major, channel-minor) input row makes every
    # conv window a contiguous static lane slice -> no sublane shuffles at all.
    xc = x_ref[...].astype(cdt)                                # (B, T0*c0)
    w1 = w1_ref[...]
    s1 = s1_ref[...]                                           # (1, C1) f32
    win = k1 * c0
    h = [jnp.maximum(
            jnp.dot(xc[:, t * c0: t * c0 + win], w1,
                    preferred_element_type=jnp.float32) + s1, 0.0)
         for t in range(T1)]                                   # T1 slabs of (B, C1) f32

    # ---- blocks 2/3: im2col per output step = lane-axis concat of K shifted slabs
    # (each slab is a 128-lane multiple, so the concat is vreg-aligned) and one
    # 2D MXU dot against the (K*C_in, C_out) folded weight.  f32 epilogue.
    def conv_bn_relu(slabs, w_ref, s_ref, K, T_out):
        w = w_ref[...]
        s = s_ref[...]                                         # (1, C_out) f32
        slabs_c = [a.astype(cdt) for a in slabs]
        return [jnp.maximum(
                    jnp.dot(jnp.concatenate([slabs_c[t + k] for k in range(K)],
                                            axis=-1),
                            w, preferred_element_type=jnp.float32) + s, 0.0)
                for t in range(T_out)]

    h = conv_bn_relu(h, w2_ref, s2_ref, k2, T2)                # T2 x (B, C2)
    h = conv_bn_relu(h, w3_ref, s3_ref, k3, T3)                # T3 x (B, C3)

    # ---- AdaptiveAvgPool1d(1): elementwise sum of the T3 slabs (1/T3 folded into
    # wfc) -- no sublane reductions, no 1-row concats.
    pooled = h[0]
    for t in range(1, T3):
        pooled = pooled + h[t]                                 # (B, C3) f32

    # ---- pad rows to the output's sublane-padded height so the single store is a
    # full, unmasked vst (padded rows carry only the bias; sliced off outside).
    rows = o_ref.shape[0]
    if rows > B:
        pooled = jnp.concatenate(
            [pooled, jnp.zeros((rows - B, pooled.shape[1]), jnp.float32)], axis=0)

    # ---- Linear epilogue (pool scale folded into wfc), lane-dense output slab.
    o_ref[...] = jnp.dot(pooled.astype(cdt), wfc_ref[...],
                         preferred_element_type=jnp.float32) + bfc_ref[...]


# --------------------------------------------------------------------------
# Host-side one-time parameter folding (bias + BN into weights, 1/T3 into fc)
# --------------------------------------------------------------------------
def _fold_conv_bn(w, b, gamma, beta, mean, var, eps=1e-5, dtype=jnp.float32):
    """Fold conv bias + eval-mode BN into a (K*C_in, C_out) weight + (1, C_out) shift."""
    C_out, C_in, K = w.shape
    scale = gamma / jnp.sqrt(var + eps)                                # (C_out,)
    w_mat = jnp.transpose(w, (2, 1, 0)).reshape(K * C_in, C_out)       # row = k*C_in + c
    w_mat = (w_mat * scale[None, :]).astype(dtype)
    shift = ((b - mean) * scale + beta).reshape(1, C_out).astype(jnp.float32)
    return w_mat, shift


def prepare_params(params, seq_len, use_bf16=True):
    """use_bf16=True: bf16 MXU operands (f32 accumulate + f32 epilogue in-kernel)."""
    dtype = jnp.bfloat16 if use_bf16 else jnp.float32
    w1, s1 = _fold_conv_bn(*params["block1"], dtype=dtype)
    w2, s2 = _fold_conv_bn(*params["block2"], dtype=dtype)
    w3, s3 = _fold_conv_bn(*params["block3"], dtype=dtype)
    K1 = params["block1"][0].shape[2]
    K2 = params["block2"][0].shape[2]
    K3 = params["block3"][0].shape[2]
    T3 = seq_len - (K1 - 1) - (K2 - 1) - (K3 - 1)      # pooled length after block3
    assert T3 >= 1, f"seq_len={seq_len} too small for kernel sizes {K1},{K2},{K3}"
    C3, num_class = params["fc_w"].shape
    n_pad = pl.cdiv(num_class, LANE) * LANE            # lane-dense output slab
    wfc = jnp.zeros((C3, n_pad), jnp.float32).at[:, :num_class].set(
        params["fc_w"] / float(T3)).astype(dtype)      # pool 1/T3 folded into fc weight
    bfc = jnp.zeros((1, n_pad), jnp.float32).at[:, :num_class].set(params["fc_b"])
    return dict(w1=w1, s1=s1, w2=w2, s2=s2, w3=w3, s3=s3, wfc=wfc, bfc=bfc)


# --------------------------------------------------------------------------
# Forward: ONE pallas_call (+ a free reshape and a trivial slice)
# --------------------------------------------------------------------------
@functools.partial(jax.jit, static_argnums=(2, 3))
def model_forward(x, fp, num_class, batch_block=None):
    """x: (B, T, enc_in) float32 (PyTorch layout).  Returns (B, num_class) float32.

    batch_block=None  -> single gridless invocation (best for small B).
    batch_block=512.. -> batch-tiled "parallel" grid for real batch sizes
                         (multiple of 8; weights stay VMEM-resident across steps).
    """
    B, T0, C0 = x.shape
    C1 = fp["w1"].shape[1]
    C2 = fp["w2"].shape[1]
    K1 = fp["w1"].shape[0] // C0
    K2 = fp["w2"].shape[0] // C1
    K3 = fp["w3"].shape[0] // C2
    n_pad = fp["wfc"].shape[1]
    kern = functools.partial(_fused_fcn_kernel, c0=C0, k1=K1, k2=K2, k3=K3)

    x2 = x.reshape(B, T0 * C0)          # contiguous row-major -> free (bitcast) reshape
    weights = (fp["w1"], fp["s1"], fp["w2"], fp["s2"],
               fp["w3"], fp["s3"], fp["wfc"], fp["bfc"])

    if batch_block is None or B <= batch_block:
        # Single invocation, no grid: avoids the 1-step pipeline overhead entirely.
        rows = max(8, pl.cdiv(B, 8) * 8)               # sublane-padded -> full vst
        out_pad = pl.pallas_call(
            kern,
            out_shape=jax.ShapeDtypeStruct((rows, n_pad), jnp.float32),
        )(x2, *weights)
        return out_pad[:B, :num_class]

    # Batch-tiled grid: row blocks processed in parallel (>=2 steps keeps both v7x
    # TensorCores busy); weights get constant index_maps so the pipeline fetches
    # them once and keeps them VMEM-resident across steps.
    assert batch_block % 8 == 0, "batch_block must be a multiple of 8"
    steps = pl.cdiv(B, batch_block)
    B_pad = steps * batch_block
    if B_pad != B:
        x2 = jnp.pad(x2, ((0, B_pad - B), (0, 0)))
    const2 = lambda i: (0, 0)
    out_pad = pl.pallas_call(
        kern,
        out_shape=jax.ShapeDtypeStruct((B_pad, n_pad), jnp.float32),
        grid=(steps,),
        in_specs=[pl.BlockSpec((batch_block, T0 * C0), lambda i: (i, 0))]
                + [pl.BlockSpec(w.shape, const2) for w in weights],
        out_specs=pl.BlockSpec((batch_block, n_pad), lambda i: (i, 0)),
        compiler_params=pltpu.CompilerParams(
            dimension_semantics=("parallel",)),
    )(x2, *weights)
    return out_pad[:B, :num_class]


# --------------------------------------------------------------------------
# Deterministic parameter init (fresh-init BN buffers, eval-mode semantics)
# --------------------------------------------------------------------------
def init_params(key, enc_in, num_class, seq_len):
    assert 6 <= seq_len <= 10, \
        "this script instantiates the seq_len <= 10 branch (kernels 3,3,2); need seq_len>=6"
    ks = jax.random.split(key, 12)

    def conv_block(kw, kb, kg, kbeta, c_in, c_out, ksz):
        fan_in = c_in * ksz
        w = jax.random.normal(kw, (c_out, c_in, ksz), jnp.float32) / jnp.sqrt(fan_in)
        b = jax.random.normal(kb, (c_out,), jnp.float32) * 0.1
        gamma = 1.0 + 0.1 * jax.random.normal(kg, (c_out,), jnp.float32)
        beta = 0.1 * jax.random.normal(kbeta, (c_out,), jnp.float32)
        mean = jnp.zeros((c_out,), jnp.float32)   # BN running_mean (fresh init)
        var = jnp.ones((c_out,), jnp.float32)     # BN running_var  (fresh init)
        return (w, b, gamma, beta, mean, var)

    params = {
        "block1": conv_block(ks[0], ks[1], ks[2], ks[3], enc_in, 128, 3),
        "block2": conv_block(ks[4], ks[5], ks[6], ks[7], 128, 256, 3),
        "block3": conv_block(ks[8], ks[9], ks[10], ks[11], 256, 128, 2),
    }
    kf1, kf2 = jax.random.split(jax.random.fold_in(key, 99))
    params["fc_w"] = jax.random.normal(kf1, (128, num_class), jnp.float32) / jnp.sqrt(128.0)
    params["fc_b"] = jax.random.normal(kf2, (num_class,), jnp.float32) * 0.1
    return params


def reference_forward(x_btc, params, eps=1e-5):
    """Pure-JAX/XLA reference with identical (eval-mode) semantics."""
    x = jnp.transpose(x_btc, (0, 2, 1))                    # (B, C, T)
    for name in ("block1", "block2", "block3"):
        w, b, gamma, beta, mean, var = params[name]
        y = jax.lax.conv_general_dilated(
            x, w, window_strides=(1,), padding="VALID",
            dimension_numbers=("NCH", "OIH", "NCH"))
        y = y + b[None, :, None]
        scale = gamma / jnp.sqrt(var + eps)
        y = scale[None, :, None] * (y - mean[None, :, None]) + beta[None, :, None]
        x = jnp.maximum(y, 0.0)
    pooled = jnp.mean(x, axis=-1)                          # AdaptiveAvgPool1d(1)
    return pooled @ params["fc_w"] + params["fc_b"]


if __name__ == "__main__":
    B, seq_len, enc_in, num_class = 2, 8, 4, 6             # seq_len <= 10 branch
    key = jax.random.PRNGKey(0)
    kx, kp = jax.random.split(key)

    x = jax.random.normal(kx, (B, seq_len, enc_in), jnp.float32)   # (B, T, C)
    params = init_params(kp, enc_in, num_class, seq_len)
    ref = reference_forward(x, params)

    # f32-operand path: matches the eval-mode module tightly.
    fp32 = prepare_params(params, seq_len, use_bf16=False)
    out32 = jax.block_until_ready(model_forward(x, fp32, num_class))
    assert out32.shape == (B, num_class), out32.shape
    err32 = float(jnp.max(jnp.abs(out32 - ref)))
    assert bool(jnp.allclose(out32, ref, rtol=1e-3, atol=1e-3)), err32

    # Default bf16 MXU-operand fast path (f32 accumulation + f32 epilogue).
    fbf16 = prepare_params(params, seq_len, use_bf16=True)
    out16 = jax.block_until_ready(model_forward(x, fbf16, num_class))
    err16 = float(jnp.max(jnp.abs(out16 - ref)))
    assert bool(jnp.allclose(out16, ref, rtol=5e-2, atol=5e-2)), err16

    # Batch-tiled "parallel" grid path (2 steps -> exercises the v7x two-TC path).
    Bb = 16
    xb = jax.random.normal(jax.random.fold_in(key, 7), (Bb, seq_len, enc_in), jnp.float32)
    refb = reference_forward(xb, params)
    outb = jax.block_until_ready(model_forward(xb, fbf16, num_class, 8))
    assert outb.shape == (Bb, num_class), outb.shape
    errb = float(jnp.max(jnp.abs(outb - refb)))
    assert bool(jnp.allclose(outb, refb, rtol=5e-2, atol=5e-2)), errb

    print("KERNEL_OK")
</pallas_src>

<mosaic_0001>
module attributes {stable_mosaic.version = 11 : i64} {
  func.func @_fused_fcn_kernel(%arg0: memref<2x32xf32, #tpu.memory_space<vmem>>, %arg1: memref<12x128xf32, #tpu.memory_space<vmem>>, %arg2: memref<1x128xf32, #tpu.memory_space<vmem>>, %arg3: memref<384x256xf32, #tpu.memory_space<vmem>>, %arg4: memref<1x256xf32, #tpu.memory_space<vmem>>, %arg5: memref<512x128xf32, #tpu.memory_space<vmem>>, %arg6: memref<1x128xf32, #tpu.memory_space<vmem>>, %arg7: memref<128x128xf32, #tpu.memory_space<vmem>>, %arg8: memref<1x128xf32, #tpu.memory_space<vmem>>, %arg9: memref<8x128xf32, #tpu.memory_space<vmem>>) attributes {dimension_semantics = [], scalar_prefetch = 0 : i64, scratch_operands = 0 : i64, tpu.core_type = #tpu.core_type<tc>} {
    %c0 = arith.constant 0 : index
    %c0_0 = arith.constant 0 : index
    %0 = vector.load %arg0[%c0, %c0_0] : memref<2x32xf32, #tpu.memory_space<vmem>>, vector<2x32xf32>
    %c0_1 = arith.constant 0 : index
    %c0_2 = arith.constant 0 : index
    %1 = vector.load %arg1[%c0_1, %c0_2] : memref<12x128xf32, #tpu.memory_space<vmem>>, vector<12x128xf32>
    %c0_3 = arith.constant 0 : index
    %c0_4 = arith.constant 0 : index
    %2 = vector.load %arg2[%c0_3, %c0_4] : memref<1x128xf32, #tpu.memory_space<vmem>>, vector<1x128xf32>
    %3 = vector.extract_strided_slice %0 {offsets = [0, 0], sizes = [2, 12], strides = [1, 1]} : vector<2x32xf32> to vector<2x12xf32>
    %cst = arith.constant dense<0.000000e+00> : vector<2x128xf32>
    %4 = tpu.matmul %3, %1, %cst {dimension_numbers = #tpu.dot_dimension_numbers<[1], [0], [0], [1], [0, 0, 1, 1], [], []>} : vector<2x12xf32>, vector<12x128xf32>, vector<2x128xf32> -> vector<2x128xf32>
    %5 = vector.broadcast %2 : vector<1x128xf32> to vector<2x128xf32>
    %6 = arith.addf %4, %5 : vector<2x128xf32>
    %cst_5 = arith.constant 0.000000e+00 : f32
    %7 = vector.broadcast %cst_5 : f32 to vector<2x128xf32>
    %8 = arith.maximumf %6, %7 : vector<2x128xf32>
    %9 = vector.extract_strided_slice %0 {offsets = [0, 4], sizes = [2, 12], strides = [1, 1]} : vector<2x32xf32> to vector<2x12xf32>
    %cst_6 = arith.constant dense<0.000000e+00> : vector<2x128xf32>
    %10 = tpu.matmul %9, %1, %cst_6 {dimension_numbers = #tpu.dot_dimension_numbers<[1], [0], [0], [1], [0, 0, 1, 1], [], []>} : vector<2x12xf32>, vector<12x128xf32>, vector<2x128xf32> -> vector<2x128xf32>
    %11 = vector.broadcast %2 : vector<1x128xf32> to vector<2x128xf32>
    %12 = arith.addf %10, %11 : vector<2x128xf32>
    %cst_7 = arith.constant 0.000000e+00 : f32
    %13 = vector.broadcast %cst_7 : f32 to vector<2x128xf32>
    %14 = arith.maximumf %12, %13 : vector<2x128xf32>
    %15 = vector.extract_strided_slice %0 {offsets = [0, 8], sizes = [2, 12], strides = [1, 1]} : vector<2x32xf32> to vector<2x12xf32>
    %cst_8 = arith.constant dense<0.000000e+00> : vector<2x128xf32>
    %16 = tpu.matmul %15, %1, %cst_8 {dimension_numbers = #tpu.dot_dimension_numbers<[1], [0], [0], [1], [0, 0, 1, 1], [], []>} : vector<2x12xf32>, vector<12x128xf32>, vector<2x128xf32> -> vector<2x128xf32>
    %17 = vector.broadcast %2 : vector<1x128xf32> to vector<2x128xf32>
    %18 = arith.addf %16, %17 : vector<2x128xf32>
    %cst_9 = arith.constant 0.000000e+00 : f32
    %19 = vector.broadcast %cst_9 : f32 to vector<2x128xf32>
    %20 = arith.maximumf %18, %19 : vector<2x128xf32>
    %21 = vector.extract_strided_slice %0 {offsets = [0, 12], sizes = [2, 12], strides = [1, 1]} : vector<2x32xf32> to vector<2x12xf32>
    %cst_10 = arith.constant dense<0.000000e+00> : vector<2x128xf32>
    %22 = tpu.matmul %21, %1, %cst_10 {dimension_numbers = #tpu.dot_dimension_numbers<[1], [0], [0], [1], [0, 0, 1, 1], [], []>} : vector<2x12xf32>, vector<12x128xf32>, vector<2x128xf32> -> vector<2x128xf32>
    %23 = vector.broadcast %2 : vector<1x128xf32> to vector<2x128xf32>
    %24 = arith.addf %22, %23 : vector<2x128xf32>
    %cst_11 = arith.constant 0.000000e+00 : f32
    %25 = vector.broadcast %cst_11 : f32 to vector<2x128xf32>
    %26 = arith.maximumf %24, %25 : vector<2x128xf32>
    %27 = vector.extract_strided_slice %0 {offsets = [0, 16], sizes = [2, 12], strides = [1, 1]} : vector<2x32xf32> to vector<2x12xf32>
    %cst_12 = arith.constant dense<0.000000e+00> : vector<2x128xf32>
    %28 = tpu.matmul %27, %1, %cst_12 {dimension_numbers = #tpu.dot_dimension_numbers<[1], [0], [0], [1], [0, 0, 1, 1], [], []>} : vector<2x12xf32>, vector<12x128xf32>, vector<2x128xf32> -> vector<2x128xf32>
    %29 = vector.broadcast %2 : vector<1x128xf32> to vector<2x128xf32>
    %30 = arith.addf %28, %29 : vector<2x128xf32>
    %cst_13 = arith.constant 0.000000e+00 : f32
    %31 = vector.broadcast %cst_13 : f32 to vector<2x128xf32>
    %32 = arith.maximumf %30, %31 : vector<2x128xf32>
    %33 = vector.extract_strided_slice %0 {offsets = [0, 20], sizes = [2, 12], strides = [1, 1]} : vector<2x32xf32> to vector<2x12xf32>
    %cst_14 = arith.constant dense<0.000000e+00> : vector<2x128xf32>
    %34 = tpu.matmul %33, %1, %cst_14 {dimension_numbers = #tpu.dot_dimension_numbers<[1], [0], [0], [1], [0, 0, 1, 1], [], []>} : vector<2x12xf32>, vector<12x128xf32>, vector<2x128xf32> -> vector<2x128xf32>
    %35 = vector.broadcast %2 : vector<1x128xf32> to vector<2x128xf32>
    %36 = arith.addf %34, %35 : vector<2x128xf32>
    %cst_15 = arith.constant 0.000000e+00 : f32
    %37 = vector.broadcast %cst_15 : f32 to vector<2x128xf32>
    %38 = arith.maximumf %36, %37 : vector<2x128xf32>
    %c0_16 = arith.constant 0 : index
    %c0_17 = arith.constant 0 : index
    %39 = vector.load %arg3[%c0_16, %c0_17] : memref<384x256xf32, #tpu.memory_space<vmem>>, vector<384x256xf32>
    %c0_18 = arith.constant 0 : index
    %c0_19 = arith.constant 0 : index
    %40 = vector.load %arg4[%c0_18, %c0_19] : memref<1x256xf32, #tpu.memory_space<vmem>>, vector<1x256xf32>
    %41 = tpu.concatenate %8, %14, %20 in 1 : vector<2x128xf32>, vector<2x128xf32>, vector<2x128xf32> -> vector<2x384xf32>
    %cst_20 = arith.constant dense<0.000000e+00> : vector<2x256xf32>
    %42 = tpu.matmul %41, %39, %cst_20 {dimension_numbers = #tpu.dot_dimension_numbers<[1], [0], [0], [1], [0, 0, 1, 1], [], []>} : vector<2x384xf32>, vector<384x256xf32>, vector<2x256xf32> -> vector<2x256xf32>
    %43 = vector.broadcast %40 : vector<1x256xf32> to vector<2x256xf32>
    %44 = arith.addf %42, %43 : vector<2x256xf32>
    %cst_21 = arith.constant 0.000000e+00 : f32
    %45 = vector.broadcast %cst_21 : f32 to vector<2x256xf32>
    %46 = arith.maximumf %44, %45 : vector<2x256xf32>
    %47 = tpu.concatenate %14, %20, %26 in 1 : vector<2x128xf32>, vector<2x128xf32>, vector<2x128xf32> -> vector<2x384xf32>
    %cst_22 = arith.constant dense<0.000000e+00> : vector<2x256xf32>
    %48 = tpu.matmul %47, %39, %cst_22 {dimension_numbers = #tpu.dot_dimension_numbers<[1], [0], [0], [1], [0, 0, 1, 1], [], []>} : vector<2x384xf32>, vector<384x256xf32>, vector<2x256xf32> -> vector<2x256xf32>
    %49 = vector.broadcast %40 : vector<1x256xf32> to vector<2x256xf32>
    %50 = arith.addf %48, %49 : vector<2x256xf32>
    %cst_23 = arith.constant 0.000000e+00 : f32
    %51 = vector.broadcast %cst_23 : f32 to vector<2x256xf32>
    %52 = arith.maximumf %50, %51 : vector<2x256xf32>
    %53 = tpu.concatenate %20, %26, %32 in 1 : vector<2x128xf32>, vector<2x128xf32>, vector<2x128xf32> -> vector<2x384xf32>
    %cst_24 = arith.constant dense<0.000000e+00> : vector<2x256xf32>
    %54 = tpu.matmul %53, %39, %cst_24 {dimension_numbers = #tpu.dot_dimension_numbers<[1], [0], [0], [1], [0, 0, 1, 1], [], []>} : vector<2x384xf32>, vector<384x256xf32>, vector<2x256xf32> -> vector<2x256xf32>
    %55 = vector.broadcast %40 : vector<1x256xf32> to vector<2x256xf32>
    %56 = arith.addf %54, %55 : vector<2x256xf32>
    %cst_25 = arith.constant 0.000000e+00 : f32
    %57 = vector.broadcast %cst_25 : f32 to vector<2x256xf32>
    %58 = arith.maximumf %56, %57 : vector<2x256xf32>
    %59 = tpu.concatenate %26, %32, %38 in 1 : vector<2x128xf32>, vector<2x128xf32>, vector<2x128xf32> -> vector<2x384xf32>
    %cst_26 = arith.constant dense<0.000000e+00> : vector<2x256xf32>
    %60 = tpu.matmul %59, %39, %cst_26 {dimension_numbers = #tpu.dot_dimension_numbers<[1], [0], [0], [1], [0, 0, 1, 1], [], []>} : vector<2x384xf32>, vector<384x256xf32>, vector<2x256xf32> -> vector<2x256xf32>
    %61 = vector.broadcast %40 : vector<1x256xf32> to vector<2x256xf32>
    %62 = arith.addf %60, %61 : vector<2x256xf32>
    %cst_27 = arith.constant 0.000000e+00 : f32
    %63 = vector.broadcast %cst_27 : f32 to vector<2x256xf32>
    %64 = arith.maximumf %62, %63 : vector<2x256xf32>
    %c0_28 = arith.constant 0 : index
    %c0_29 = arith.constant 0 : index
    %65 = vector.load %arg5[%c0_28, %c0_29] : memref<512x128xf32, #tpu.memory_space<vmem>>, vector<512x128xf32>
    %c0_30 = arith.constant 0 : index
    %c0_31 = arith.constant 0 : index
    %66 = vector.load %arg6[%c0_30, %c0_31] : memref<1x128xf32, #tpu.memory_space<vmem>>, vector<1x128xf32>
    %67 = tpu.concatenate %46, %52 in 1 : vector<2x256xf32>, vector<2x256xf32> -> vector<2x512xf32>
    %cst_32 = arith.constant dense<0.000000e+00> : vector<2x128xf32>
    %68 = tpu.matmul %67, %65, %cst_32 {dimension_numbers = #tpu.dot_dimension_numbers<[1], [0], [0], [1], [0, 0, 1, 1], [], []>} : vector<2x512xf32>, vector<512x128xf32>, vector<2x128xf32> -> vector<2x128xf32>
    %69 = vector.broadcast %66 : vector<1x128xf32> to vector<2x128xf32>
    %70 = arith.addf %68, %69 : vector<2x128xf32>
    %cst_33 = arith.constant 0.000000e+00 : f32
    %71 = vector.broadcast %cst_33 : f32 to vector<2x128xf32>
    %72 = arith.maximumf %70, %71 : vector<2x128xf32>
    %73 = tpu.concatenate %52, %58 in 1 : vector<2x256xf32>, vector<2x256xf32> -> vector<2x512xf32>
    %cst_34 = arith.constant dense<0.000000e+00> : vector<2x128xf32>
    %74 = tpu.matmul %73, %65, %cst_34 {dimension_numbers = #tpu.dot_dimension_numbers<[1], [0], [0], [1], [0, 0, 1, 1], [], []>} : vector<2x512xf32>, vector<512x128xf32>, vector<2x128xf32> -> vector<2x128xf32>
    %75 = vector.broadcast %66 : vector<1x128xf32> to vector<2x128xf32>
    %76 = arith.addf %74, %75 : vector<2x128xf32>
    %cst_35 = arith.constant 0.000000e+00 : f32
    %77 = vector.broadcast %cst_35 : f32 to vector<2x128xf32>
    %78 = arith.maximumf %76, %77 : vector<2x128xf32>
    %79 = tpu.concatenate %58, %64 in 1 : vector<2x256xf32>, vector<2x256xf32> -> vector<2x512xf32>
    %cst_36 = arith.constant dense<0.000000e+00> : vector<2x128xf32>
    %80 = tpu.matmul %79, %65, %cst_36 {dimension_numbers = #tpu.dot_dimension_numbers<[1], [0], [0], [1], [0, 0, 1, 1], [], []>} : vector<2x512xf32>, vector<512x128xf32>, vector<2x128xf32> -> vector<2x128xf32>
    %81 = vector.broadcast %66 : vector<1x128xf32> to vector<2x128xf32>
    %82 = arith.addf %80, %81 : vector<2x128xf32>
    %cst_37 = arith.constant 0.000000e+00 : f32
    %83 = vector.broadcast %cst_37 : f32 to vector<2x128xf32>
    %84 = arith.maximumf %82, %83 : vector<2x128xf32>
    %85 = arith.addf %72, %78 : vector<2x128xf32>
    %86 = arith.addf %85, %84 : vector<2x128xf32>
    %cst_38 = arith.constant 0.000000e+00 : f32
    %87 = vector.broadcast %cst_38 : f32 to vector<6x128xf32>
    %88 = tpu.concatenate %86, %87 in 0 : vector<2x128xf32>, vector<6x128xf32> -> vector<8x128xf32>
    %c0_39 = arith.constant 0 : index
    %c0_40 = arith.constant 0 : index
    %89 = vector.load %arg7[%c0_39, %c0_40] : memref<128x128xf32, #tpu.memory_space<vmem>>, vector<128x128xf32>
    %cst_41 = arith.constant dense<0.000000e+00> : vector<8x128xf32>
    %90 = tpu.matmul %88, %89, %cst_41 {dimension_numbers = #tpu.dot_dimension_numbers<[1], [0], [0], [1], [0, 0, 1, 1], [], []>} : vector<8x128xf32>, vector<128x128xf32>, vector<8x128xf32> -> vector<8x128xf32>
    %c0_42 = arith.constant 0 : index
    %c0_43 = arith.constant 0 : index
    %91 = vector.load %arg8[%c0_42, %c0_43] : memref<1x128xf32, #tpu.memory_space<vmem>>, vector<1x128xf32>
    %92 = vector.broadcast %91 : vector<1x128xf32> to vector<8x128xf32>
    %93 = arith.addf %90, %92 : vector<8x128xf32>
    %c0_44 = arith.constant 0 : index
    %c0_45 = arith.constant 0 : index
    %94 = vector.load %arg9[%c0_44, %c0_45] : memref<8x128xf32, #tpu.memory_space<vmem>>, vector<8x128xf32>
    tpu.vector_store %arg9[%c0_44, %c0_45], %93 {strides = array<i32>} : memref<8x128xf32, #tpu.memory_space<vmem>>, vector<8x128xf32>,
    return
  }
}

</mosaic_0001>

<bundles_post_ra>
// kernel: model_forward.1
= control target key start
LH: loop header
LB: loop body
LE: loop exit
PB: predicated region body
PF: predicated region fallthrough
CT: control target
= control target key end

     0   :  { %14 = vsyncpa [#allocation3], 0  ;;  %s3568_s0 = inlined_call_operand.vmem [shape: f32[2,32], index: 0, kind: input, shape index: {}]   ;;  %s3569_s1 = inlined_call_operand.vmem [shape: f32[12,128], index: 1, kind: input, shape index: {}]   ;;  %s3570_s2 = inlined_call_operand.vmem [shape: f32[1,128], index: 2, kind: input, shape index: {}]   ;;  %s3571_s3 = inlined_call_operand.hbm [shape: f32[384,256], index: 3, kind: input, shape index: {}]   ;;  %s3572_s4 = inlined_call_operand.vmem [shape: f32[1,256], index: 4, kind: input, shape index: {}]   ;;  %s3573_s5 = inlined_call_operand.hbm [shape: f32[512,128], index: 5, kind: input, shape index: {}]   ;;  %s3574_s6 = inlined_call_operand.vmem [shape: f32[1,128], index: 6, kind: input, shape index: {}]   ;;  %s3575_s7 = inlined_call_operand.hbm [shape: f32[128,128], index: 7, kind: input, shape index: {}]   ;;  %s3576_s8 = inlined_call_operand.vmem [shape: f32[1,128], index: 8, kind: input, shape index: {}]   ;;  %s3577_s9 = inlined_call_operand.vmem [shape: f32[8,128], index: 9, kind: output, shape index: {}]  }
   0x1   :  { %15 = vsyncpa [#allocation5], 0  ;;  %s2883_s30 = smov [#allocation4]   ;;  %s2813_s13 = scalar_lea.hbm %s3573_s5, 8192 }
   0x2   :  { %s41_s10 = sshll.u32 %s2883_s30, 4  ;;  %p2814_p0 = scmp.ne.s32.totalorder %s3573_s5, %s2813_s13  ;;  %s42_s10 = int_to_ptr.vmem [resolvable:$true] %s41_s10 }
   0x3   :  { %p2817_p1 = scmp.lt.u32.totalorder %s2813_s13, %s3573_s5 }
   0x5   :  { %p2819_p2 = pnand %p2817_p1, %p2814_p0 }
   0x7   :  { %2822 = shalt.err (!%p2819_p2)
}
   0x8   :  { %s2823_s18 = scalar_lea.vmem %s42_s10, 8192  ;;  %p2828_p4 = scmp.lt.s32.totalorder %s42_s10, %s42_s10 }
   0x9   :  { %p2824_p3 = scmp.ne.s32.totalorder %s42_s10, %s2823_s18  ;;  %p2829_p5 = scmp.lt.s32.totalorder %s2823_s18, %s2823_s18 }
   0xb   :  { %p2830_p6 = por %p2829_p5, %p2828_p4 }
   0xd   :  { %p2831_p7 = pnand %p2830_p6, %p2824_p3 }
   0xf   :  { %2834 = shalt.err (!%p2831_p7)
}
  0x10   :  { %s2884_s19 = smov 128   ;;  %s2885_s20 = smov 8  }
  0x11   :  { %47 = dma.hbm_to_vmem [thread:$0]  %s3573_s5, 8192, %s42_s10, [#allocation5], %s2884_s19, %s2884_s19, %s2885_s20  }
  0x12   :  { %s2886_s23 = smov [#allocation2]   ;;  %s2835_s27 = scalar_lea.hbm %s3571_s3, 12288 }
  0x13   :  { %s27_s24 = sshll.u32 %s2886_s23, 4  ;;  %p2836_p8 = scmp.ne.s32.totalorder %s3571_s3, %s2835_s27  ;;  %s28_s24 = int_to_ptr.vmem [resolvable:$true] %s27_s24 }
  0x14   :  { %p2839_p9 = scmp.lt.u32.totalorder %s2835_s27, %s3571_s3 }
  0x16   :  { %p2841_p10 = pnand %p2839_p9, %p2836_p8 }
  0x18   :  { %2844 = shalt.err (!%p2841_p10)
}
  0x19   :  { %s2845_s12 = scalar_lea.vmem %s28_s24, 12288  ;;  %p2850_p12 = scmp.lt.s32.totalorder %s28_s24, %s28_s24 }
  0x1a   :  { %p2846_p11 = scmp.ne.s32.totalorder %s28_s24, %s2845_s12  ;;  %p2851_p13 = scmp.lt.s32.totalorder %s2845_s12, %s2845_s12 }
  0x1c   :  { %p2852_p0 = por %p2851_p13, %p2850_p12 }
  0x1e   :  { %p2853_p1 = pnand %p2852_p0, %p2846_p11 }
  0x20   :  { %2856 = shalt.err (!%p2853_p1)
}
  0x21   :  { %s2887_s5 = smov 256   ;;  %s2888_s10 = smov 16  }
  0x22   :  { %33 = dma.hbm_to_vmem [thread:$0]  %s3571_s3, 12288, %s28_s24, [#allocation3], %s2887_s5, %s2887_s5, %s2888_s10  }
  0x23   :  { %s2889_s15 = smov [#allocation6]   ;;  %s2857_s21 = scalar_lea.hbm %s3575_s7, 2048 }
  0x24   :  { %s55_s16 = sshll.u32 %s2889_s15, 4  ;;  %p2858_p2 = scmp.ne.s32.totalorder %s3575_s7, %s2857_s21  ;;  %s56_s16 = int_to_ptr.vmem [resolvable:$true] %s55_s16 }
  0x25   :  { %p2861_p3 = scmp.lt.u32.totalorder %s2857_s21, %s3575_s7 }
  0x27   :  { %p2863_p4 = pnand %p2861_p3, %p2858_p2 }
  0x29   :  { %2866 = shalt.err (!%p2863_p4)
}
  0x2a   :  { %s2867_s27 = scalar_lea.vmem %s56_s16, 2048  ;;  %p2872_p6 = scmp.lt.s32.totalorder %s56_s16, %s56_s16 }
  0x2b   :  { %p2868_p5 = scmp.ne.s32.totalorder %s56_s16, %s2867_s27  ;;  %p2873_p7 = scmp.lt.s32.totalorder %s2867_s27, %s2867_s27 }
  0x2d   :  { %p2874_p8 = por %p2873_p7, %p2872_p6 }
  0x2f   :  { %p2875_p9 = pnand %p2874_p8, %p2868_p5 }
  0x31   :  { %2878 = shalt.err (!%p2875_p9)
}
  0x32   :  { %61 = dma.hbm_to_vmem [thread:$0]  %s3575_s7, 2048, %s56_s16, [#allocation5], %s2884_s19, %s2884_s19, %s2885_s20  }
  0x33   :  { %2879 = dma.done.wait [#allocation3], 12288  }
  0x34   :  { %2880 = vsyncadd [#allocation3], 4294955008 }
  0x35   :  { %2881 = dma.done.wait [#allocation5], 10240  }
  0x36   :  { %2882 = vsyncadd [#allocation5], 4294957056  ;;  %v2890_v0 = vmov 0.0|0.0   ;;  %vm2891_vm0 = vmmov 0   ;;  %v2892_v1 = vmov 0.0   ;;  %vm87_vm1 = vcmask 1043456  }
  0x37   :  { %2157 = vmatprep.subr.bf16.mxu1 %v2890_v0  ;;  %2084 = vmatprep.mubr.msk.f32.mxu1 %vm2891_vm0, %v2892_v1  ;;  %vm2893_vm2 = vmmov 1   ;;  %v73_v3 = vld [vmem:[%s3568_s0] sm:$0x3]  ;;  %v75_v5 = vld [vmem:[%s3569_s1 + $0x8] sm:$0xf]  ;;  %s2894_s11 = smov 124  }
  0x38   :  { %vm2994_vm3 = vmpackc.low %vm87_vm1, %vm2893_vm2  ;;  %v74_v4 = vld [vmem:[%s3569_s1] sm:$0xff]  ;;  %162 = vrot.lane.b32.xlu0 %v73_v3, %s2894_s11  ;;  %s2895_s12 = smov 116   ;;  %vm83_vm4 = vcmask 97280   ;;  %v538_v7 = vld [vmem:[#allocation2 + $0x8] sm:$0xff]  ;;  %s2896_s0 = smov 120   ;;  %vm1717_vm5 = vcmask 1041408  }
  0x39   :  { %312 = vrot.lane.b32.xlu1 %v73_v3, %s2895_s12  ;;  %v3007_v6 = vpack.c.bf16 %v75_v5, %v74_v4  ;;  %v540_v8 = vld [vmem:[#allocation2 + $0x18] sm:$0xff]  ;;  %v537_v9 = vld [vmem:[#allocation2] sm:$0xff]  ;;  %s2897_s5 = smov 112   ;;  %v539_v11 = vld [vmem:[#allocation2 + $0x10] sm:$0xff]  ;;  %s2898_s1 = smov 108  }
  0x3a   :  { %v3013_v10 = vpack.c.bf16 %v540_v8, %v538_v7  ;;  %v542_v12 = vld [vmem:[#allocation2 + $0x28] sm:$0xff]  ;;  %v544_v13 = vld [vmem:[#allocation2 + $0x38] sm:$0xff]  ;;  %v3016_v14 = vpack.c.bf16 %v539_v11, %v537_v9  ;;  %v541_v16 = vld [vmem:[#allocation2 + $0x20] sm:$0xff] }
  0x3b   :  { %2160 = vmatpush3.bf16.msk.msra.mxu1 %vm2994_vm3, %v3007_v6  ;;  %v3018_v15 = vpack.c.bf16 %v544_v13, %v542_v12  ;;  %v543_v17 = vld [vmem:[#allocation2 + $0x30] sm:$0xff]  ;;  %v546_v18 = vld [vmem:[#allocation2 + $0x48] sm:$0xff]  ;;  %v548_v19 = vld [vmem:[#allocation2 + $0x58] sm:$0xff] }
  0x3c   :  { %2161 = vmatprep.subr.bf16.mxu1 %v2890_v0  ;;  %237 = vrot.lane.b32.xlu0 %v73_v3, %s2896_s0  ;;  %v3028_v20 = vpack.c.bf16 %v543_v17, %v541_v16  ;;  %v3031_v21 = vpack.c.bf16 %v548_v19, %v546_v18  ;;  %v545_v22 = vld [vmem:[#allocation2 + $0x40] sm:$0xff]  ;;  %v547_v23 = vld [vmem:[#allocation2 + $0x50] sm:$0xff]  ;;  %v550_v24 = vld [vmem:[#allocation2 + $0x68] sm:$0xff] }
  0x3d   :  { %387 = vrot.lane.b32.xlu1 %v73_v3, %s2897_s5  ;;  %2182 = vmatprep.subr.bf16.mxu0 %v3013_v10  ;;  %v552_v25 = vld [vmem:[#allocation2 + $0x78] sm:$0xff]  ;;  %v3034_v26 = vpack.c.bf16 %v547_v23, %v545_v22  ;;  %v549_v28 = vld [vmem:[#allocation2 + $0x60] sm:$0xff]  ;;  %v551_v29 = vld [vmem:[#allocation2 + $0x70] sm:$0xff] }
  0x3e   :  { %2085 = vmatmul.mubr.msk.f32.vlgmr.msra.gmra.mrb[0].mxu1 %vm83_vm4, %v73_v3  ;;  %2184 = vmatpush1.bf16.msra.mxu0 %v3016_v14  ;;  %v3037_v27 = vpack.c.bf16 %v552_v25, %v550_v24  ;;  %v554_v30 = vld [vmem:[#allocation2 + $0x88] sm:$0xff]  ;;  %v556_v31 = vld [vmem:[#allocation2 + $0x98] sm:$0xff]  ;;  %v3040_v32 = vpack.c.bf16 %v551_v29, %v549_v28  ;;  %v553_v34 = vld [vmem:[#allocation2 + $0x80] sm:$0xff] }
  0x3f   :  { %2164 = vmatpush3.bf16.msk.msra.mxu1 %vm2994_vm3, %v3007_v6  ;;  %2091 = vmatprep.mubr.msk.f32.mxu1 %vm2891_vm0, %v2892_v1  ;;  %v3043_v33 = vpack.c.bf16 %v556_v31, %v554_v30  ;;  %v555_v35 = vld [vmem:[#allocation2 + $0x90] sm:$0xff]  ;;  %v558_v36 = vld [vmem:[#allocation2 + $0xa8] sm:$0xff]  ;;  %v560_v37 = vld [vmem:[#allocation2 + $0xb8] sm:$0xff] }
  0x40   :  { %2165 = vmatprep.subr.bf16.mxu1 %v2890_v0  ;;  %462 = vrot.lane.b32.xlu0 %v73_v3, %s2898_s1  ;;  %v3046_v38 = vpack.c.bf16 %v555_v35, %v553_v34  ;;  %v3049_v39 = vpack.c.bf16 %v560_v37, %v558_v36  ;;  %v557_v40 = vld [vmem:[#allocation2 + $0xa0] sm:$0xff]  ;;  %v559_v41 = vld [vmem:[#allocation2 + $0xb0] sm:$0xff]  ;;  %v562_v42 = vld [vmem:[#allocation2 + $0xc8] sm:$0xff] }
  0x41   :  { %2186 = vmatprep.subr.bf16.mxu0 %v3018_v15  ;;  %v564_v43 = vld [vmem:[#allocation2 + $0xd8] sm:$0xff]  ;;  %v3052_v44 = vpack.c.bf16 %v559_v41, %v557_v40  ;;  %v561_v46 = vld [vmem:[#allocation2 + $0xc0] sm:$0xff]  ;;  %v563_v47 = vld [vmem:[#allocation2 + $0xd0] sm:$0xff] }
  0x42   :  { %2188 = vmatpush1.bf16.msra.mxu0 %v3028_v20  ;;  %v3055_v45 = vpack.c.bf16 %v564_v43, %v562_v42  ;;  %v566_v48 = vld [vmem:[#allocation2 + $0xe8] sm:$0xff]  ;;  %v568_v49 = vld [vmem:[#allocation2 + $0xf8] sm:$0xff]  ;;  %v3058_v50 = vpack.c.bf16 %v563_v47, %v561_v46  ;;  %v565_v52 = vld [vmem:[#allocation2 + $0xe0] sm:$0xff] }
  0x43   :  { %2190 = vmatprep.subr.bf16.mxu0 %v3031_v21  ;;  %v3061_v51 = vpack.c.bf16 %v568_v49, %v566_v48  ;;  %v567_v53 = vld [vmem:[#allocation2 + $0xf0] sm:$0xff]  ;;  %v570_v54 = vld [vmem:[#allocation2 + $0x108] sm:$0xff]  ;;  %v572_v55 = vld [vmem:[#allocation2 + $0x118] sm:$0xff] }
  0x44   :  { %v3064_v56 = vpack.c.bf16 %v567_v53, %v565_v52  ;;  %v3067_v57 = vpack.c.bf16 %v572_v55, %v570_v54  ;;  %v569_v58 = vld [vmem:[#allocation2 + $0x100] sm:$0xff]  ;;  %v571_v59 = vld [vmem:[#allocation2 + $0x110] sm:$0xff]  ;;  %v574_v60 = vld [vmem:[#allocation2 + $0x128] sm:$0xff] }
  0x45   :  { %v576_v61 = vld [vmem:[#allocation2 + $0x138] sm:$0xff]  ;;  %v3070_v62 = vpack.c.bf16 %v571_v59, %v569_v58  ;;  %v573_v3 = vld [vmem:[#allocation2 + $0x120] sm:$0xff]  ;;  %v575_v4 = vld [vmem:[#allocation2 + $0x130] sm:$0xff] }
  0x46   :  { %2192 = vmatpush1.bf16.msra.mxu0 %v3034_v26  ;;  %v3073_v63 = vpack.c.bf16 %v576_v61, %v574_v60  ;;  %v578_v5 = vld [vmem:[#allocation2 + $0x148] sm:$0xff]  ;;  %v580_v7 = vld [vmem:[#allocation2 + $0x158] sm:$0xff]  ;;  %v3076_v8 = vpack.c.bf16 %v575_v4, %v573_v3  ;;  %v577_v11 = vld [vmem:[#allocation2 + $0x140] sm:$0xff] }
  0x47   :  { %2194 = vmatprep.subr.bf16.mxu0 %v3037_v27  ;;  %v3079_v9 = vpack.c.bf16 %v580_v7, %v578_v5  ;;  %v579_v12 = vld [vmem:[#allocation2 + $0x150] sm:$0xff]  ;;  %v582_v13 = vld [vmem:[#allocation2 + $0x168] sm:$0xff]  ;;  %v584_v16 = vld [vmem:[#allocation2 + $0x178] sm:$0xff] }
  0x48   :  { %v3082_v17 = vpack.c.bf16 %v579_v12, %v577_v11  ;;  %v3085_v18 = vpack.c.bf16 %v584_v16, %v582_v13  ;;  %v581_v19 = vld [vmem:[#allocation2 + $0x160] sm:$0xff]  ;;  %v583_v22 = vld [vmem:[#allocation2 + $0x170] sm:$0xff]  ;;  %v586_v23 = vld [vmem:[#allocation2 + $0x188] sm:$0xff] }
  0x49   :  { %v588_v24 = vld [vmem:[#allocation2 + $0x198] sm:$0xff]  ;;  %v3088_v25 = vpack.c.bf16 %v583_v22, %v581_v19  ;;  %v585_v29 = vld [vmem:[#allocation2 + $0x180] sm:$0xff]  ;;  %v587_v30 = vld [vmem:[#allocation2 + $0x190] sm:$0xff] }
  0x4a   :  { %2196 = vmatpush1.bf16.msra.mxu0 %v3040_v32  ;;  %v3091_v28 = vpack.c.bf16 %v588_v24, %v586_v23  ;;  %v590_v31 = vld [vmem:[#allocation2 + $0x1a8] sm:$0xff]  ;;  %v592_v34 = vld [vmem:[#allocation2 + $0x1b8] sm:$0xff]  ;;  %v3094_v35 = vpack.c.bf16 %v587_v30, %v585_v29  ;;  %v589_v37 = vld [vmem:[#allocation2 + $0x1a0] sm:$0xff] }
  0x4b   :  { %2198 = vmatprep.subr.bf16.mxu0 %v3043_v33  ;;  %v3097_v36 = vpack.c.bf16 %v592_v34, %v590_v31  ;;  %v591_v40 = vld [vmem:[#allocation2 + $0x1b0] sm:$0xff]  ;;  %v594_v42 = vld [vmem:[#allocation2 + $0x1c8] sm:$0xff]  ;;  %v596_v43 = vld [vmem:[#allocation2 + $0x1d8] sm:$0xff] }
  0x4c   :  { %v3100_v41 = vpack.c.bf16 %v591_v40, %v589_v37  ;;  %v593_v46 = vld [vmem:[#allocation2 + $0x1c0] sm:$0xff]  ;;  %v3104_v47 = vpack.c.bf16 %v596_v43, %v594_v42  ;;  %v595_v48 = vld [vmem:[#allocation2 + $0x1d0] sm:$0xff]  ;;  %v598_v2 = vld [vmem:[#allocation2 + $0x1e8] sm:$0xff] }
  0x4d   :  { %v3106_v49 = vpack.c.bf16 %v595_v48, %v593_v46  ;;  %v597_v60 = vld [vmem:[#allocation2 + $0x1e0] sm:$0xff]  ;;  %v599_v61 = vld [vmem:[#allocation2 + $0x1f0] sm:$0xff]  ;;  %v602_v4 = vld [vmem:[#allocation2 + $0x208] sm:$0xff] }
  0x4e   :  { %2200 = vmatpush1.bf16.msra.mxu0 %v3046_v38  ;;  %v3170_v3 = vpack.c.bf16 %v599_v61, %v597_v60  ;;  %v604_v5 = vld [vmem:[#allocation2 + $0x218] sm:$0xff]  ;;  %v3183_v13 = vld [vmem:[%s3570_s2] ss:$0 sm:$0xff]  ;;  %v603_v23 = vld [vmem:[#allocation2 + $0x210] sm:$0xff] }
  0x4f   :  { %2202 = vmatprep.subr.bf16.mxu0 %v3049_v39  ;;  %v3176_v7 = vpack.c.bf16 %v604_v5, %v602_v4  ;;  %v601_v22 = vld [vmem:[#allocation2 + $0x200] sm:$0xff]  ;;  %v606_v30 = vld [vmem:[#allocation2 + $0x228] sm:$0xff]  ;;  %v608_v31 = vld [vmem:[#allocation2 + $0x238] sm:$0xff] }
  0x50   :  { %v3187_v37 = vpack.c.bf16 %v603_v23, %v601_v22  ;;  %v3189_v43 = vpack.c.bf16 %v608_v31, %v606_v30  ;;  %v605_v46 = vld [vmem:[#allocation2 + $0x220] sm:$0xff]  ;;  %v607_v48 = vld [vmem:[#allocation2 + $0x230] sm:$0xff]  ;;  %v614_v5 = vld [vmem:[#allocation2 + $0x268] sm:$0xff] }
  0x51   :  { %v609_v60 = vld [vmem:[#allocation2 + $0x240] sm:$0xff]  ;;  %v611_v61 = vld [vmem:[#allocation2 + $0x250] sm:$0xff]  ;;  %v620_v30 = vld [vmem:[#allocation2 + $0x298] sm:$0xff] }
  0x52   :  { %2204 = vmatpush1.bf16.msra.mxu0 %v3052_v44  ;;  %v613_v22 = vld [vmem:[#allocation2 + $0x260] sm:$0xff]  ;;  %v615_v23 = vld [vmem:[#allocation2 + $0x270] sm:$0xff] }
  0x53   :  { %2206 = vmatprep.subr.bf16.mxu0 %v3055_v45 }
  0x56   :  { %2208 = vmatpush1.bf16.msra.mxu0 %v3058_v50 }
  0x57   :  { %2210 = vmatprep.subr.bf16.mxu0 %v3061_v51 }
  0x5a   :  { %2212 = vmatpush1.bf16.msra.mxu0 %v3064_v56 }
  0x5b   :  { %2214 = vmatprep.subr.bf16.mxu0 %v3067_v57 }
  0x5e   :  { %2216 = vmatpush1.bf16.msra.mxu0 %v3070_v62 }
  0x5f   :  { %2218 = vmatprep.subr.bf16.mxu0 %v3073_v63 }
  0x62   :  { %2220 = vmatpush1.bf16.msra.mxu0 %v3076_v8 }
  0x63   :  { %2222 = vmatprep.subr.bf16.mxu0 %v3079_v9 }
  0x66   :  { %2224 = vmatpush1.bf16.msra.mxu0 %v3082_v17 }
  0x67   :  { %2226 = vmatprep.subr.bf16.mxu0 %v3085_v18 }
  0x6a   :  { %2228 = vmatpush1.bf16.msra.mxu0 %v3088_v25 }
  0x6b   :  { %2230 = vmatprep.subr.bf16.mxu0 %v3091_v28 }
  0x6e   :  { %2232 = vmatpush1.bf16.msra.mxu0 %v3094_v35 }
  0x6f   :  { %2234 = vmatprep.subr.bf16.mxu0 %v3097_v36 }
  0x72   :  { %2236 = vmatpush1.bf16.msra.mxu0 %v3100_v41 }
  0x73   :  { %2238 = vmatprep.subr.bf16.mxu0 %v3104_v47 }
  0x76   :  { %2240 = vmatpush1.bf16.msra.mxu0 %v3106_v49 }
  0xaa   :  { %v163_v52 = vpop.permute.xlu0 %162 }
  0xab   :  { %2092 = vmatmul.mubr.msk.f32.vlgmr.msra.gmra.mrb[2].mxu1 %vm83_vm4, %v163_v52  ;;  %v313_v54 = vpop.permute.xlu1 %312 }
  0xac   :  { %2168 = vmatpush3.bf16.msk.msra.mxu1 %vm2994_vm3, %v3007_v6  ;;  %2098 = vmatprep.mubr.msk.f32.mxu1 %vm2891_vm0, %v2892_v1 }
  0xad   :  { %2169 = vmatprep.subr.bf16.mxu1 %v2890_v0 }
  0xae   :  { %v238_v53 = vpop.permute.xlu0 %237 }
  0xaf   :  { %2099 = vmatmul.mubr.msk.f32.vlgmr.msra.gmra.mrb[4].mxu1 %vm83_vm4, %v238_v53  ;;  %v388_v55 = vpop.permute.xlu1 %387  ;;  %v610_v53 = vld [vmem:[#allocation2 + $0x248] sm:$0xff] }
  0xb0   :  { %2172 = vmatpush3.bf16.msk.msra.mxu1 %vm2994_vm3, %v3007_v6  ;;  %2105 = vmatprep.mubr.msk.f32.mxu1 %vm2891_vm0, %v2892_v1 }
  0xb1   :  { %2173 = vmatprep.subr.bf16.mxu1 %v2890_v0 }
  0xb2   :  { %v463_v58 = vpop.permute.xlu0 %462 }
  0xb3   :  { %2106 = vmatmul.mubr.msk.f32.vlgmr.msra.gmra.mrb[6].mxu1 %vm83_vm4, %v313_v54  ;;  %v612_v54 = vld [vmem:[#allocation2 + $0x258] sm:$0xff] }
  0xb4   :  { %2176 = vmatpush3.bf16.msk.msra.mxu1 %vm2994_vm3, %v3007_v6  ;;  %2112 = vmatprep.mubr.msk.f32.mxu1 %vm2891_vm0, %v2892_v1 }
  0xb5   :  { %2177 = vmatprep.subr.bf16.mxu1 %v2890_v0 }
  0xb7   :  { %2113 = vmatmul.mubr.msk.f32.vlgmr.msra.gmra.mrb[8].mxu1 %vm83_vm4, %v388_v55 }
  0xb8   :  { %2180 = vmatpush3.bf16.msk.msra.mxu1 %vm2994_vm3, %v3007_v6  ;;  %2119 = vmatprep.mubr.msk.f32.mxu1 %vm2891_vm0, %v2892_v1  ;;  %v600_v6 = vld [vmem:[#allocation2 + $0x1f8] sm:$0xff] }
  0xb9   :  { %2278 = vmatprep.subr.bf16.mxu1 %v3013_v10  ;;  %v3168_v59 = vpack.c.bf16 %v600_v6, %v598_v2  ;;  %v3195_v2 = vpack.c.bf16 %v607_v48, %v605_v46  ;;  %v3199_v6 = vpack.c.bf16 %v612_v54, %v610_v53  ;;  %v619_v46 = vld [vmem:[#allocation2 + $0x290] sm:$0xff]  ;;  %v624_v53 = vld [vmem:[#allocation2 + $0x2b8] sm:$0xff] }
  0xbb   :  { %2120 = vmatmul.mubr.msk.f32.vlgmr.msra.gmra.mrb[10].mxu1 %vm83_vm4, %v463_v58  ;;  %2242 = vmatprep.subr.bf16.mxu0 %v3168_v59 }
  0xbc   :  { %2280 = vmatpush1.bf16.msra.mxu1 %v3016_v14  ;;  %2244 = vmatpush1.bf16.msra.mxu0 %v3170_v3 }
  0xbd   :  { %2282 = vmatprep.subr.bf16.mxu1 %v3018_v15  ;;  %2246 = vmatprep.subr.bf16.mxu0 %v3176_v7 }
  0xc0   :  { %2284 = vmatpush1.bf16.msra.mxu1 %v3028_v20 }
  0xc1   :  { %2286 = vmatprep.subr.bf16.mxu1 %v3031_v21 }
  0xc4   :  { %2288 = vmatpush1.bf16.msra.mxu1 %v3034_v26 }
  0xc5   :  { %2290 = vmatprep.subr.bf16.mxu1 %v3037_v27 }
  0xc8   :  { %2292 = vmatpush1.bf16.msra.mxu1 %v3040_v32 }
  0xc9   :  { %2294 = vmatprep.subr.bf16.mxu1 %v3043_v33 }
  0xcc   :  { %2296 = vmatpush1.bf16.msra.mxu1 %v3046_v38 }
  0xcd   :  { %2298 = vmatprep.subr.bf16.mxu1 %v3049_v39 }
  0xd0   :  { %2300 = vmatpush1.bf16.msra.mxu1 %v3052_v44 }
  0xd1   :  { %2302 = vmatprep.subr.bf16.mxu1 %v3055_v45 }
  0xd4   :  { %2304 = vmatpush1.bf16.msra.mxu1 %v3058_v50 }
  0xd5   :  { %2306 = vmatprep.subr.bf16.mxu1 %v3061_v51 }
  0xd8   :  { %2308 = vmatpush1.bf16.msra.mxu1 %v3064_v56 }
  0xd9   :  { %2310 = vmatprep.subr.bf16.mxu1 %v3067_v57 }
  0xdc   :  { %2312 = vmatpush1.bf16.msra.mxu1 %v3070_v62 }
  0xdd   :  { %2314 = vmatprep.subr.bf16.mxu1 %v3073_v63 }
  0xe0   :  { %2316 = vmatpush1.bf16.msra.mxu1 %v3076_v8 }
  0xe1   :  { %2318 = vmatprep.subr.bf16.mxu1 %v3079_v9 }
  0xe4   :  { %2320 = vmatpush1.bf16.msra.mxu1 %v3082_v17 }
  0xe5   :  { %2322 = vmatprep.subr.bf16.mxu1 %v3085_v18 }
  0xe8   :  { %2324 = vmatpush1.bf16.msra.mxu1 %v3088_v25 }
  0xe9   :  { %2326 = vmatprep.subr.bf16.mxu1 %v3091_v28 }
  0xec   :  { %2328 = vmatpush1.bf16.msra.mxu1 %v3094_v35 }
  0xed   :  { %2330 = vmatprep.subr.bf16.mxu1 %v3097_v36 }
  0xf0   :  { %2332 = vmatpush1.bf16.msra.mxu1 %v3100_v41 }
  0xf1   :  { %2334 = vmatprep.subr.bf16.mxu1 %v3104_v47 }
  0xf4   :  { %2336 = vmatpush1.bf16.msra.mxu1 %v3106_v49 }
  0xf5   :  { %2338 = vmatprep.subr.bf16.mxu1 %v3168_v59 }
  0xf8   :  { %2340 = vmatpush1.bf16.msra.mxu1 %v3170_v3 }
  0xf9   :  { %2342 = vmatprep.subr.bf16.mxu1 %v3176_v7 }
 0x111   :  { %v157_v11 = vpop.f32.mrb[0].mxu1 }
 0x112   :  { %v2086_v12 = vpop.f32.mrb[1].mxu1  ;;  %v158_v16 = vadd.f32 %v3183_v13, %v157_v11  ;;  %v616_v11 = vld [vmem:[#allocation2 + $0x278] sm:$0xff] }
 0x114   :  { %v161_v40 = vmax.f32 %v158_v16, 0.0  ;;  %v3206_v16 = vpack.c.bf16 %v611_v61, %v609_v60  ;;  %v621_v61 = vld [vmem:[#allocation2 + $0x2a0] sm:$0xff] }
 0x17e   :  { %v232_v19 = vpop.f32.mrb[2].mxu1 }
 0x17f   :  { %v233_v24 = vadd.f32 %v3183_v13, %v232_v19  ;;  %v2093_v29 = vpop.f32.mrb[3].mxu1  ;;  %v3210_v19 = vpack.c.bf16 %v616_v11, %v614_v5  ;;  %v623_v5 = vld [vmem:[#allocation2 + $0x2b0] sm:$0xff]  ;;  %v626_v11 = vld [vmem:[#allocation2 + $0x2c8] sm:$0xff] }
 0x180   :  { %v618_v29 = vld [vmem:[#allocation2 + $0x288] sm:$0xff] }
 0x181   :  { %v236_v34 = vmax.f32 %v233_v24, 0.0 }
 0x182   :  { %v307_v42 = vpop.f32.mrb[4].mxu1 }
 0x183   :  { %v308_v52 = vadd.f32 %v3183_v13, %v307_v42  ;;  %709 = vmatprep.mubr.f32.mxu0 %v236_v34  ;;  %v2100_v55 = vpop.f32.mrb[5].mxu1  ;;  %v617_v42 = vld [vmem:[#allocation2 + $0x280] sm:$0xff] }
 0x184   :  { %710 = vmatmul.mubr.f32.vlgmr.msra.gmra.mrb[0].mxu0 %v161_v40  ;;  %v3219_v40 = vpack.c.bf16 %v620_v30, %v618_v29  ;;  %v3225_v55 = vpack.c.bf16 %v619_v46, %v617_v42  ;;  %v625_v29 = vld [vmem:[#allocation2 + $0x2c0] sm:$0xff]  ;;  %v627_v30 = vld [vmem:[#allocation2 + $0x2d0] sm:$0xff]  ;;  %v632_v42 = vld [vmem:[#allocation2 + $0x2f8] sm:$0xff] }
 0x185   :  { %v3192_v58 = vmax.f32 %v308_v52, 0.0  ;;  %2248 = vmatpush1.bf16.msra.mxu0 %v3187_v37  ;;  %780 = vmatprep.mubr.f32.mxu0 %v2892_v1  ;;  %v622_v52 = vld [vmem:[#allocation2 + $0x2a8] sm:$0xff]  ;;  %v3241_v46 = vpack.c.bf16 %v627_v30, %v625_v29 }
 0x186   :  { %2250 = vmatprep.subr.bf16.mxu0 %v3189_v43  ;;  %v3201_v4 = vpop.f32.mrb[6].mxu1  ;;  %v3229_v60 = vpack.c.bf16 %v624_v53, %v622_v52  ;;  %v629_v53 = vld [vmem:[#allocation2 + $0x2e0] sm:$0xff]  ;;  %v1230_v29 = vld [vmem:[#allocation4 + $0x48] sm:$0xff] }
 0x187   :  { %853 = vmatprep.mubr.f32.mxu1 %v3192_v58  ;;  %v2107_v12 = vpop.f32.mrb[7].mxu1 }
 0x188   :  { %854 = vmatmul.mubr.f32.vlgmr.msra.gmra.mrb[12].mxu1 %v236_v34  ;;  %v3215_v34 = vpack.c.bf16 %v615_v23, %v613_v22  ;;  %v628_v12 = vld [vmem:[#allocation2 + $0x2d8] sm:$0xff]  ;;  %v3233_v22 = vpack.c.bf16 %v623_v5, %v621_v61  ;;  %v383_v5 = vadd.f32 %v3183_v13, %v3201_v4 }
 0x189   :  { %2252 = vmatpush1.bf16.msra.mxu0 %v3195_v2  ;;  %2344 = vmatpush1.bf16.msra.mxu1 %v3187_v37  ;;  %v3237_v23 = vpack.c.bf16 %v628_v12, %v626_v11 }
 0x18a   :  { %2254 = vmatprep.subr.bf16.mxu0 %v3199_v6  ;;  %2346 = vmatprep.subr.bf16.mxu1 %v3189_v43  ;;  %v457_v24 = vpop.f32.mrb[8].mxu1  ;;  %v3262_v12 = vmax.f32 %v383_v5, 0.0 }
 0x18b   :  { %924 = vmatprep.mubr.f32.mxu1 %v2892_v1  ;;  %v2114_v31 = vpop.f32.mrb[9].mxu1  ;;  %v3260_v11 = vadd.f32 %v3183_v13, %v457_v24  ;;  %v1258_v24 = vld [vmem:[#allocation4 + $0x128] sm:$0xff] }
 0x18c   :  { %v630_v31 = vld [vmem:[#allocation2 + $0x2e8] sm:$0xff] }
 0x18d   :  { %2256 = vmatpush1.bf16.msra.mxu0 %v3206_v16  ;;  %2348 = vmatpush1.bf16.msra.mxu1 %v3195_v2  ;;  %v3245_v52 = vpack.c.bf16 %v632_v42, %v630_v31  ;;  %v461_v4 = vmax.f32 %v3260_v11, 0.0  ;;  %v1259_v42 = vld [vmem:[#allocation4 + $0x130] sm:$0xff] }
 0x18e   :  { %2258 = vmatprep.subr.bf16.mxu0 %v3210_v19  ;;  %2350 = vmatprep.subr.bf16.mxu1 %v3199_v6  ;;  %v3221_v48 = vpop.f32.mrb[10].mxu1 }
 0x18f   :  { %v2121_v54 = vpop.f32.mrb[11].mxu1 }
 0x190   :  { %v631_v54 = vld [vmem:[#allocation2 + $0x2f0] sm:$0xff] }
 0x191   :  { %2260 = vmatpush1.bf16.msra.mxu0 %v3215_v34  ;;  %2352 = vmatpush1.bf16.msra.mxu1 %v3206_v16  ;;  %v3249_v61 = vpack.c.bf16 %v631_v54, %v629_v53  ;;  %v1248_v53 = vld [vmem:[#allocation4 + $0xd8] sm:$0xff]  ;;  %v1277_v54 = vld [vmem:[#allocation4 + $0x1c0] sm:$0xff] }
 0x192   :  { %2262 = vmatprep.subr.bf16.mxu0 %v3219_v40  ;;  %2354 = vmatprep.subr.bf16.mxu1 %v3210_v19 }
 0x195   :  { %2264 = vmatpush1.bf16.msra.mxu0 %v3225_v55  ;;  %2356 = vmatpush1.bf16.msra.mxu1 %v3215_v34 }
 0x196   :  { %2266 = vmatprep.subr.bf16.mxu0 %v3229_v60  ;;  %2358 = vmatprep.subr.bf16.mxu1 %v3219_v40 }
 0x199   :  { %2268 = vmatpush1.bf16.msra.mxu0 %v3233_v22  ;;  %2360 = vmatpush1.bf16.msra.mxu1 %v3225_v55 }
 0x19a   :  { %2270 = vmatprep.subr.bf16.mxu0 %v3237_v23  ;;  %2362 = vmatprep.subr.bf16.mxu1 %v3229_v60 }
 0x19d   :  { %2272 = vmatpush1.bf16.msra.mxu0 %v3241_v46  ;;  %2364 = vmatpush1.bf16.msra.mxu1 %v3233_v22 }
 0x19e   :  { %2274 = vmatprep.subr.bf16.mxu0 %v3245_v52  ;;  %2366 = vmatprep.subr.bf16.mxu1 %v3237_v23 }
 0x1a1   :  { %2276 = vmatpush1.bf16.msra.mxu0 %v3249_v61  ;;  %2368 = vmatpush1.bf16.msra.mxu1 %v3241_v46 }
 0x1a2   :  { %2370 = vmatprep.subr.bf16.mxu1 %v3245_v52  ;;  %2374 = vmatprep.subr.bf16.mxu0 %v3013_v10 }
 0x1a4   :  { %781 = vmatmul.mubr.f32.vlgmr.msra.gmra.mrb[0].mxu0 %v3192_v58 }
 0x1a5   :  { %2372 = vmatpush1.bf16.msra.mxu1 %v3249_v61  ;;  %2376 = vmatpush1.bf16.msra.mxu0 %v3016_v14 }
 0x1a6   :  { %2378 = vmatprep.subr.bf16.mxu0 %v3018_v15  ;;  %2470 = vmatprep.subr.bf16.mxu1 %v3013_v10  ;;  %v1237_v10 = vld [vmem:[#allocation4 + $0x80] sm:$0xff] }
 0x1a7   :  { %997 = vmatprep.mubr.f32.mxu0 %v3262_v12 }
 0x1a8   :  { %925 = vmatmul.mubr.f32.vlgmr.msra.gmra.mrb[12].mxu1 %v3262_v12 }
 0x1a9   :  { %2380 = vmatpush1.bf16.msra.mxu0 %v3028_v20  ;;  %2472 = vmatpush1.bf16.msra.mxu1 %v3016_v14  ;;  %v1238_v14 = vld [vmem:[#allocation4 + $0x88] sm:$0xff] }
 0x1aa   :  { %2382 = vmatprep.subr.bf16.mxu0 %v3031_v21  ;;  %2474 = vmatprep.subr.bf16.mxu1 %v3018_v15  ;;  %v3366_v15 = vpack.c.bf16 %v1238_v14, %v1237_v10 }
 0x1ab   :  { %1141 = vmatprep.mubr.f32.mxu1 %v461_v4 }
 0x1ad   :  { %2384 = vmatpush1.bf16.msra.mxu0 %v3034_v26  ;;  %2476 = vmatpush1.bf16.msra.mxu1 %v3028_v20  ;;  %v1221_v20 = vld [vmem:[#allocation4] sm:$0xff] }
 0x1ae   :  { %2386 = vmatprep.subr.bf16.mxu0 %v3037_v27  ;;  %2478 = vmatprep.subr.bf16.mxu1 %v3031_v21  ;;  %v1222_v21 = vld [vmem:[#allocation4 + $0x8] sm:$0xff] }
 0x1b1   :  { %2388 = vmatpush1.bf16.msra.mxu0 %v3040_v32  ;;  %2480 = vmatpush1.bf16.msra.mxu1 %v3034_v26  ;;  %v1239_v26 = vld [vmem:[#allocation4 + $0x90] sm:$0xff] }
 0x1b2   :  { %2390 = vmatprep.subr.bf16.mxu0 %v3043_v33  ;;  %2482 = vmatprep.subr.bf16.mxu1 %v3037_v27  ;;  %v1240_v27 = vld [vmem:[#allocation4 + $0x98] sm:$0xff] }
 0x1b5   :  { %2392 = vmatpush1.bf16.msra.mxu0 %v3046_v38  ;;  %2484 = vmatpush1.bf16.msra.mxu1 %v3040_v32  ;;  %v1269_v32 = vld [vmem:[#allocation4 + $0x180] sm:$0xff] }
 0x1b6   :  { %2394 = vmatprep.subr.bf16.mxu0 %v3049_v39  ;;  %2486 = vmatprep.subr.bf16.mxu1 %v3043_v33  ;;  %v1270_v33 = vld [vmem:[#allocation4 + $0x188] sm:$0xff] }
 0x1b9   :  { %2396 = vmatpush1.bf16.msra.mxu0 %v3052_v44  ;;  %2488 = vmatpush1.bf16.msra.mxu1 %v3046_v38  ;;  %v533_v38 = vadd.f32 %v3183_v13, %v3221_v48  ;;  %v1274_v13 = vld [vmem:[#allocation4 + $0x1a8] sm:$0xff]  ;;  %v1275_v48 = vld [vmem:[#allocation4 + $0x1b0] sm:$0xff] }
 0x1ba   :  { %2398 = vmatprep.subr.bf16.mxu0 %v3055_v45  ;;  %2490 = vmatprep.subr.bf16.mxu1 %v3049_v39  ;;  %v3372_v39 = vpack.c.bf16 %v1222_v21, %v1221_v20  ;;  %v1261_v20 = vld [vmem:[#allocation4 + $0x140] sm:$0xff]  ;;  %v1262_v21 = vld [vmem:[#allocation4 + $0x148] sm:$0xff] }
 0x1bd   :  { %2400 = vmatpush1.bf16.msra.mxu0 %v3058_v50  ;;  %2492 = vmatpush1.bf16.msra.mxu1 %v3052_v44  ;;  %v1223_v44 = vld [vmem:[#allocation4 + $0x10] sm:$0xff] }
 0x1be   :  { %2402 = vmatprep.subr.bf16.mxu0 %v3061_v51  ;;  %2494 = vmatprep.subr.bf16.mxu1 %v3055_v45  ;;  %v1224_v45 = vld [vmem:[#allocation4 + $0x18] sm:$0xff] }
 0x1c1   :  { %2404 = vmatpush1.bf16.msra.mxu0 %v3064_v56  ;;  %2496 = vmatpush1.bf16.msra.mxu1 %v3058_v50  ;;  %v3376_v50 = vpack.c.bf16 %v1240_v27, %v1239_v26  ;;  %v1249_v26 = vld [vmem:[#allocation4 + $0xe0] sm:$0xff]  ;;  %v1250_v27 = vld [vmem:[#allocation4 + $0xe8] sm:$0xff] }
 0x1c2   :  { %2406 = vmatprep.subr.bf16.mxu0 %v3067_v57  ;;  %2498 = vmatprep.subr.bf16.mxu1 %v3061_v51  ;;  %v3378_v51 = vpack.c.bf16 %v1270_v33, %v1269_v32  ;;  %v1279_v32 = vld [vmem:[#allocation4 + $0x1d0] sm:$0xff]  ;;  %v1280_v33 = vld [vmem:[#allocation4 + $0x1d8] sm:$0xff] }
 0x1c5   :  { %2408 = vmatpush1.bf16.msra.mxu0 %v3070_v62  ;;  %2500 = vmatpush1.bf16.msra.mxu1 %v3064_v56  ;;  %v1253_v56 = vld [vmem:[#allocation4 + $0x100] sm:$0xff] }
 0x1c6   :  { %2410 = vmatprep.subr.bf16.mxu0 %v3073_v63  ;;  %2502 = vmatprep.subr.bf16.mxu1 %v3067_v57  ;;  %v1254_v57 = vld [vmem:[#allocation4 + $0x108] sm:$0xff] }
 0x1c9   :  { %2412 = vmatpush1.bf16.msra.mxu0 %v3076_v8  ;;  %2504 = vmatpush1.bf16.msra.mxu1 %v3070_v62  ;;  %v1241_v62 = vld [vmem:[#allocation4 + $0xa0] sm:$0xff] }
 0x1ca   :  { %2414 = vmatprep.subr.bf16.mxu0 %v3079_v9  ;;  %2506 = vmatprep.subr.bf16.mxu1 %v3073_v63  ;;  %v1242_v63 = vld [vmem:[#allocation4 + $0xa8] sm:$0xff] }
 0x1cd   :  { %2416 = vmatpush1.bf16.msra.mxu0 %v3082_v17  ;;  %2508 = vmatpush1.bf16.msra.mxu1 %v3076_v8  ;;  %v1271_v8 = vld [vmem:[#allocation4 + $0x190] sm:$0xff] }
 0x1ce   :  { %2418 = vmatprep.subr.bf16.mxu0 %v3085_v18  ;;  %2510 = vmatprep.subr.bf16.mxu1 %v3079_v9  ;;  %v1272_v9 = vld [vmem:[#allocation4 + $0x198] sm:$0xff] }
 0x1d1   :  { %2420 = vmatpush1.bf16.msra.mxu0 %v3088_v25  ;;  %2512 = vmatpush1.bf16.msra.mxu1 %v3082_v17  ;;  %v536_v17 = vmax.f32 %v533_v38, 0.0 }
 0x1d2   :  { %2422 = vmatprep.subr.bf16.mxu0 %v3091_v28  ;;  %2514 = vmatprep.subr.bf16.mxu1 %v3085_v18  ;;  %v3384_v18 = vpack.c.bf16 %v1224_v45, %v1223_v44  ;;  %v3434_v44 = vpack.c.bf16 %v1262_v21, %v1261_v20  ;;  %v1233_v45 = vld [vmem:[#allocation4 + $0x60] sm:$0xff] }
 0x1d5   :  { %2424 = vmatpush1.bf16.msra.mxu0 %v3094_v35  ;;  %2516 = vmatpush1.bf16.msra.mxu1 %v3088_v25  ;;  %v3386_v25 = vpack.c.bf16 %v1254_v57, %v1253_v56  ;;  %v1234_v56 = vld [vmem:[#allocation4 + $0x68] sm:$0xff]  ;;  %v3438_v57 = vpack.c.bf16 %v1250_v27, %v1249_v26 }
 0x1d6   :  { %2426 = vmatprep.subr.bf16.mxu0 %v3097_v36  ;;  %2518 = vmatprep.subr.bf16.mxu1 %v3091_v28  ;;  %v1225_v28 = vld [vmem:[#allocation4 + $0x20] sm:$0xff] }
 0x1d9   :  { %2428 = vmatpush1.bf16.msra.mxu0 %v3100_v41  ;;  %2520 = vmatpush1.bf16.msra.mxu1 %v3094_v35  ;;  %v1226_v35 = vld [vmem:[#allocation4 + $0x28] sm:$0xff] }
 0x1da   :  { %2430 = vmatprep.subr.bf16.mxu0 %v3104_v47  ;;  %2522 = vmatprep.subr.bf16.mxu1 %v3097_v36  ;;  %v3390_v36 = vpack.c.bf16 %v1242_v63, %v1241_v62  ;;  %v3440_v62 = vpack.c.bf16 %v1280_v33, %v1279_v32  ;;  %v1263_v63 = vld [vmem:[#allocation4 + $0x150] sm:$0xff] }
 0x1dd   :  { %2432 = vmatpush1.bf16.msra.mxu0 %v3106_v49  ;;  %2524 = vmatpush1.bf16.msra.mxu1 %v3100_v41  ;;  %v3392_v41 = vpack.c.bf16 %v1272_v9, %v1271_v8  ;;  %v1264_v8 = vld [vmem:[#allocation4 + $0x158] sm:$0xff]  ;;  %v1251_v9 = vld [vmem:[#allocation4 + $0xf0] sm:$0xff] }
 0x1de   :  { %2434 = vmatprep.subr.bf16.mxu0 %v3168_v59  ;;  %2526 = vmatprep.subr.bf16.mxu1 %v3104_v47  ;;  %v1255_v47 = vld [vmem:[#allocation4 + $0x110] sm:$0xff] }
 0x1e1   :  { %2436 = vmatpush1.bf16.msra.mxu0 %v3170_v3  ;;  %2528 = vmatpush1.bf16.msra.mxu1 %v3106_v49  ;;  %v1256_v49 = vld [vmem:[#allocation4 + $0x118] sm:$0xff] }
 0x1e2   :  { %2438 = vmatprep.subr.bf16.mxu0 %v3176_v7  ;;  %2530 = vmatprep.subr.bf16.mxu1 %v3168_v59  ;;  %v1243_v59 = vld [vmem:[#allocation4 + $0xb0] sm:$0xff] }
 0x1e4   :  { %998 = vmatmul.mubr.f32.vlgmr.msra.gmra.mrb[2].mxu0 %v3192_v58  ;;  %v1227_v58 = vld [vmem:[#allocation4 + $0x30] sm:$0xff] }
 0x1e5   :  { %2440 = vmatpush1.bf16.msra.mxu0 %v3187_v37  ;;  %2532 = vmatpush1.bf16.msra.mxu1 %v3170_v3  ;;  %v1244_v3 = vld [vmem:[#allocation4 + $0xb8] sm:$0xff] }
 0x1e6   :  { %2442 = vmatprep.subr.bf16.mxu0 %v3189_v43  ;;  %2534 = vmatprep.subr.bf16.mxu1 %v3176_v7  ;;  %v1273_v7 = vld [vmem:[#allocation4 + $0x1a0] sm:$0xff] }
 0x1e7   :  { %1068 = vmatprep.mubr.f32.mxu0 %v2892_v1 }
 0x1e8   :  { %1142 = vmatmul.mubr.f32.vlgmr.msra.gmra.mrb[14].mxu1 %v3262_v12  ;;  %v1231_v12 = vld [vmem:[#allocation4 + $0x50] sm:$0xff] }
 0x1e9   :  { %2444 = vmatpush1.bf16.msra.mxu0 %v3195_v2  ;;  %2536 = vmatpush1.bf16.msra.mxu1 %v3187_v37  ;;  %v3396_v37 = vpack.c.bf16 %v1226_v35, %v1225_v28  ;;  %v1281_v28 = vld [vmem:[#allocation4 + $0x1e0] sm:$0xff]  ;;  %v1282_v35 = vld [vmem:[#allocation4 + $0x1e8] sm:$0xff] }
 0x1ea   :  { %2446 = vmatprep.subr.bf16.mxu0 %v3199_v6  ;;  %2538 = vmatprep.subr.bf16.mxu1 %v3189_v43  ;;  %v3398_v43 = vpack.c.bf16 %v1256_v49, %v1255_v47  ;;  %v3444_v47 = vpack.c.bf16 %v1234_v56, %v1233_v45  ;;  %v3446_v49 = vpack.c.bf16 %v1264_v8, %v1263_v63 }
 0x1eb   :  { %1212 = vmatprep.mubr.f32.mxu1 %v2892_v1 }
 0x1ed   :  { %2448 = vmatpush1.bf16.msra.mxu0 %v3206_v16  ;;  %2540 = vmatpush1.bf16.msra.mxu1 %v3195_v2  ;;  %v1228_v2 = vld [vmem:[#allocation4 + $0x38] sm:$0xff] }
 0x1ee   :  { %2450 = vmatprep.subr.bf16.mxu0 %v3210_v19  ;;  %2542 = vmatprep.subr.bf16.mxu1 %v3199_v6  ;;  %v3402_v6 = vpack.c.bf16 %v1244_v3, %v1243_v59  ;;  %v1235_v59 = vld [vmem:[#allocation4 + $0x70] sm:$0xff] }
 0x1f1   :  { %2452 = vmatpush1.bf16.msra.mxu0 %v3215_v34  ;;  %2544 = vmatpush1.bf16.msra.mxu1 %v3206_v16  ;;  %v3404_v16 = vpack.c.bf16 %v1274_v13, %v1273_v7  ;;  %v1236_v7 = vld [vmem:[#allocation4 + $0x78] sm:$0xff]  ;;  %v3452_v13 = vpack.c.bf16 %v1282_v35, %v1281_v28  ;;  %v1729_v35 = vld [vmem:[#allocation6 + $0x50] sm:$0xff] }
 0x1f2   :  { %2454 = vmatprep.subr.bf16.mxu0 %v3219_v40  ;;  %2546 = vmatprep.subr.bf16.mxu1 %v3210_v19  ;;  %v1257_v19 = vld [vmem:[#allocation4 + $0x120] sm:$0xff] }
 0x1f5   :  { %2456 = vmatpush1.bf16.msra.mxu0 %v3225_v55  ;;  %2548 = vmatpush1.bf16.msra.mxu1 %v3215_v34  ;;  %v1245_v34 = vld [vmem:[#allocation4 + $0xc0] sm:$0xff] }
 0x1f6   :  { %2458 = vmatprep.subr.bf16.mxu0 %v3229_v60  ;;  %2550 = vmatprep.subr.bf16.mxu1 %v3219_v40  ;;  %v1246_v40 = vld [vmem:[#allocation4 + $0xc8] sm:$0xff] }
 0x1f7   :  { %v3414_v30 = vpack.c.bf16 %v1246_v40, %v1245_v34  ;;  %v3456_v34 = vpack.c.bf16 %v1236_v7, %v1235_v59  ;;  %v1732_v7 = vld [vmem:[#allocation6 + $0x68] sm:$0xff] }
 0x1f9   :  { %2460 = vmatpush1.bf16.msra.mxu0 %v3233_v22  ;;  %2552 = vmatpush1.bf16.msra.mxu1 %v3225_v55  ;;  %v1276_v55 = vld [vmem:[#allocation4 + $0x1b8] sm:$0xff] }
 0x1fa   :  { %2462 = vmatprep.subr.bf16.mxu0 %v3237_v23  ;;  %2554 = vmatprep.subr.bf16.mxu1 %v3229_v60  ;;  %v3408_v60 = vpack.c.bf16 %v1228_v2, %v1227_v58  ;;  %v3416_v31 = vpack.c.bf16 %v1276_v55, %v1275_v48  ;;  %v1265_v58 = vld [vmem:[#allocation4 + $0x160] sm:$0xff]  ;;  %v1266_v2 = vld [vmem:[#allocation4 + $0x168] sm:$0xff]  ;;  %v1267_v55 = vld [vmem:[#allocation4 + $0x170] sm:$0xff] }
 0x1fb   :  { %v3458_v40 = vpack.c.bf16 %v1266_v2, %v1265_v58 }
 0x1fd   :  { %2464 = vmatpush1.bf16.msra.mxu0 %v3241_v46  ;;  %2556 = vmatpush1.bf16.msra.mxu1 %v3233_v22  ;;  %v3410_v22 = vpack.c.bf16 %v1258_v24, %v1257_v19  ;;  %v1283_v19 = vld [vmem:[#allocation4 + $0x1f0] sm:$0xff]  ;;  %v1284_v24 = vld [vmem:[#allocation4 + $0x1f8] sm:$0xff] }
 0x1fe   :  { %2466 = vmatprep.subr.bf16.mxu0 %v3245_v52  ;;  %2558 = vmatprep.subr.bf16.mxu1 %v3237_v23  ;;  %v1229_v23 = vld [vmem:[#allocation4 + $0x40] sm:$0xff]  ;;  %v3462_v48 = vpack.c.bf16 %v1284_v24, %v1283_v19 }
 0x1ff   :  { %v3420_v5 = vpack.c.bf16 %v1230_v29, %v1229_v23  ;;  %v1268_v23 = vld [vmem:[#allocation4 + $0x178] sm:$0xff]  ;;  %v1832_v19 = vld [vmem:[%s3574_s6] ss:$0 sm:$0xff] }
 0x200   :  { %v3466_v29 = vpack.c.bf16 %v1268_v23, %v1267_v55 }
 0x201   :  { %2468 = vmatpush1.bf16.msra.mxu0 %v3249_v61  ;;  %2560 = vmatpush1.bf16.msra.mxu1 %v3241_v46  ;;  %v1260_v46 = vld [vmem:[#allocation4 + $0x138] sm:$0xff] }
 0x202   :  { %2562 = vmatprep.subr.bf16.mxu1 %v3245_v52  ;;  %2566 = vmatprep.subr.bf16.mxu0 %v3366_v15  ;;  %v1247_v52 = vld [vmem:[#allocation4 + $0xd0] sm:$0xff]  ;;  %v3422_v11 = vpack.c.bf16 %v1260_v46, %v1259_v42  ;;  %v635_v42 = vlaneseq }
 0x203   :  { %v3426_v10 = vpack.c.bf16 %v1248_v53, %v1247_v52  ;;  %v633_v53 = vld [vmem:[%s3572_s4] sm:$0x3] }
 0x204   :  { %1069 = vmatmul.mubr.f32.vlgmr.msra.gmra.mrb[2].mxu0 %v461_v4  ;;  %v1232_v4 = vld [vmem:[#allocation4 + $0x58] sm:$0xff]  ;;  %v636_v46 = vshrl.u32 %v635_v42, 7 }
 0x205   :  { %2564 = vmatpush1.bf16.msra.mxu1 %v3249_v61  ;;  %2568 = vmatpush3.bf16.msra.mxu0 %v3372_v39  ;;  %v1278_v61 = vld [vmem:[#allocation4 + $0x1c8] sm:$0xff]  ;;  %v3432_v38 = vpack.c.bf16 %v1232_v4, %v1231_v12 }
 0x206   :  { %2570 = vmatprep.subr.bf16.mxu0 %v3376_v50  ;;  %2598 = vmatprep.subr.bf16.mxu1 %v3378_v51  ;;  %v3428_v14 = vpack.c.bf16 %v1278_v61, %v1277_v54  ;;  %v637_v52 = vsub.s32 0, %v636_v46  ;;  %v641_v54 = vsub.s32 1, %v636_v46 }
 0x208   :  { %1213 = vmatmul.mubr.f32.vlgmr.msra.gmra.mrb[14].mxu1 %v536_v17  ;;  %v1252_v17 = vld [vmem:[#allocation4 + $0xf8] sm:$0xff]  ;;  %v3475_v61 = vrot.slane %v633_v53, %v637_v52  ;;  %v3477_v12 = vrot.slane %v633_v53, %v641_v54 }
 0x209   :  { %2572 = vmatpush3.bf16.msra.mxu0 %v3384_v18  ;;  %2600 = vmatpush3.bf16.msra.mxu1 %v3386_v25  ;;  %v3450_v3 = vpack.c.bf16 %v1252_v17, %v1251_v9  ;;  %v1728_v17 = vld [vmem:[#allocation6 + $0x48] sm:$0xff] }
 0x20a   :  { %2574 = vmatprep.subr.bf16.mxu0 %v3390_v36  ;;  %2602 = vmatprep.subr.bf16.mxu1 %v3392_v41 }
 0x20d   :  { %2576 = vmatpush3.bf16.msra.mxu0 %v3396_v37  ;;  %2604 = vmatpush3.bf16.msra.mxu1 %v3398_v43 }
 0x20e   :  { %2578 = vmatprep.subr.bf16.mxu0 %v3402_v6  ;;  %2606 = vmatprep.subr.bf16.mxu1 %v3404_v16 }
 0x211   :  { %2580 = vmatpush3.bf16.msra.mxu0 %v3408_v60  ;;  %2608 = vmatpush3.bf16.msra.mxu1 %v3410_v22 }
 0x212   :  { %2582 = vmatprep.subr.bf16.mxu0 %v3414_v30  ;;  %2610 = vmatprep.subr.bf16.mxu1 %v3416_v31 }
 0x215   :  { %2584 = vmatpush3.bf16.msra.mxu0 %v3420_v5  ;;  %2612 = vmatpush3.bf16.msra.mxu1 %v3422_v11 }
 0x216   :  { %2586 = vmatprep.subr.bf16.mxu0 %v3426_v10  ;;  %2614 = vmatprep.subr.bf16.mxu1 %v3428_v14 }
 0x219   :  { %2588 = vmatpush3.bf16.msra.mxu0 %v3432_v38  ;;  %2616 = vmatpush3.bf16.msra.mxu1 %v3434_v44 }
 0x21a   :  { %2590 = vmatprep.subr.bf16.mxu0 %v3438_v57  ;;  %2618 = vmatprep.subr.bf16.mxu1 %v3440_v62 }
 0x21d   :  { %2592 = vmatpush3.bf16.msra.mxu0 %v3444_v47  ;;  %2620 = vmatpush3.bf16.msra.mxu1 %v3446_v49 }
 0x21e   :  { %2594 = vmatprep.subr.bf16.mxu0 %v3450_v3  ;;  %2622 = vmatprep.subr.bf16.mxu1 %v3452_v13 }
 0x221   :  { %2596 = vmatpush3.bf16.msra.mxu0 %v3456_v34  ;;  %2624 = vmatpush3.bf16.msra.mxu1 %v3458_v40 }
 0x222   :  { %2630 = vmatprep.subr.bf16.mxu0 %v3366_v15  ;;  %2626 = vmatprep.subr.bf16.mxu1 %v3462_v48 }
 0x225   :  { %2628 = vmatpush3.bf16.msra.mxu1 %v3466_v29 }
 0x226   :  { %2662 = vmatprep.subr.bf16.mxu1 %v3378_v51 }
 0x277   :  { %v782_v4 = vpop.f32.mrb[0].mxu0 }
 0x278   :  { %v2781_v20 = vadd.f32 %v782_v4, %v3475_v61  ;;  %v784_v21 = vpop.f32.mrb[1].mxu0 }
 0x279   :  { %v2782_v26 = vadd.f32 %v784_v21, %v3477_v12 }
 0x27a   :  { %v787_v33 = vmax.f32 %v2781_v20, 0.0 }
 0x27b   :  { %v788_v27 = vmax.f32 %v2782_v26, 0.0  ;;  %v926_v32 = vpop.f32.mrb[12].mxu1 }
 0x27c   :  { %v2783_v45 = vadd.f32 %v926_v32, %v3475_v61  ;;  %v928_v56 = vpop.f32.mrb[13].mxu1 }
 0x27d   :  { %v2784_v63 = vadd.f32 %v928_v56, %v3477_v12  ;;  %1356 = vmatprep.mubr.f32.mxu0 %v788_v27 }
 0x27e   :  { %1357 = vmatmul.mubr.f32.vlgmr.msra.gmra.mrb[4].mxu0 %v787_v33  ;;  %v931_v9 = vmax.f32 %v2783_v45, 0.0 }
 0x27f   :  { %v932_v8 = vmax.f32 %v2784_v63, 0.0  ;;  %2632 = vmatpush3.bf16.msra.mxu0 %v3372_v39 }
 0x280   :  { %2634 = vmatprep.subr.bf16.mxu0 %v3376_v50 }
 0x281   :  { %1426 = vmatprep.mubr.f32.mxu1 %v932_v8  ;;  %1497 = vmatprep.mubr.f32.mxu0 %v932_v8 }
 0x282   :  { %1427 = vmatmul.mubr.f32.vlgmr.msra.gmra.mrb[16].mxu1 %v931_v9 }
 0x283   :  { %2636 = vmatpush3.bf16.msra.mxu0 %v3384_v18  ;;  %2664 = vmatpush3.bf16.msra.mxu1 %v3386_v25 }
 0x284   :  { %2638 = vmatprep.subr.bf16.mxu0 %v3390_v36  ;;  %2666 = vmatprep.subr.bf16.mxu1 %v3392_v41 }
 0x287   :  { %2640 = vmatpush3.bf16.msra.mxu0 %v3396_v37  ;;  %2668 = vmatpush3.bf16.msra.mxu1 %v3398_v43 }
 0x288   :  { %2642 = vmatprep.subr.bf16.mxu0 %v3402_v6  ;;  %2670 = vmatprep.subr.bf16.mxu1 %v3404_v16 }
 0x28b   :  { %2644 = vmatpush3.bf16.msra.mxu0 %v3408_v60  ;;  %2672 = vmatpush3.bf16.msra.mxu1 %v3410_v22 }
 0x28c   :  { %2646 = vmatprep.subr.bf16.mxu0 %v3414_v30  ;;  %2674 = vmatprep.subr.bf16.mxu1 %v3416_v31 }
 0x28f   :  { %2648 = vmatpush3.bf16.msra.mxu0 %v3420_v5  ;;  %2676 = vmatpush3.bf16.msra.mxu1 %v3422_v11 }
 0x290   :  { %2650 = vmatprep.subr.bf16.mxu0 %v3426_v10  ;;  %2678 = vmatprep.subr.bf16.mxu1 %v3428_v14 }
 0x293   :  { %2652 = vmatpush3.bf16.msra.mxu0 %v3432_v38  ;;  %2680 = vmatpush3.bf16.msra.mxu1 %v3434_v44 }
 0x294   :  { %2654 = vmatprep.subr.bf16.mxu0 %v3438_v57  ;;  %2682 = vmatprep.subr.bf16.mxu1 %v3440_v62 }
 0x297   :  { %2656 = vmatpush3.bf16.msra.mxu0 %v3444_v47  ;;  %2684 = vmatpush3.bf16.msra.mxu1 %v3446_v49 }
 0x298   :  { %2658 = vmatprep.subr.bf16.mxu0 %v3450_v3  ;;  %2686 = vmatprep.subr.bf16.mxu1 %v3452_v13 }
 0x29b   :  { %2660 = vmatpush3.bf16.msra.mxu0 %v3456_v34  ;;  %2688 = vmatpush3.bf16.msra.mxu1 %v3458_v40 }
 0x29c   :  { %2694 = vmatprep.subr.bf16.mxu0 %v3366_v15  ;;  %2690 = vmatprep.subr.bf16.mxu1 %v3462_v48 }
 0x29e   :  { %1498 = vmatmul.mubr.f32.vlgmr.msra.gmra.mrb[6].mxu0 %v931_v9 }
 0x29f   :  { %2696 = vmatpush3.bf16.msra.mxu0 %v3372_v39  ;;  %2692 = vmatpush3.bf16.msra.mxu1 %v3466_v29 }
 0x2a0   :  { %2698 = vmatprep.subr.bf16.mxu0 %v3376_v50  ;;  %2726 = vmatprep.subr.bf16.mxu1 %v3378_v51 }
 0x2a3   :  { %2700 = vmatpush3.bf16.msra.mxu0 %v3384_v18 }
 0x2a4   :  { %2702 = vmatprep.subr.bf16.mxu0 %v3390_v36 }
 0x2a7   :  { %2704 = vmatpush3.bf16.msra.mxu0 %v3396_v37 }
 0x2a8   :  { %2706 = vmatprep.subr.bf16.mxu0 %v3402_v6 }
 0x2ab   :  { %2708 = vmatpush3.bf16.msra.mxu0 %v3408_v60 }
 0x2ac   :  { %2710 = vmatprep.subr.bf16.mxu0 %v3414_v30 }
 0x2af   :  { %2712 = vmatpush3.bf16.msra.mxu0 %v3420_v5 }
 0x2b0   :  { %2714 = vmatprep.subr.bf16.mxu0 %v3426_v10  ;;  %v1724_v10 = vld [vmem:[#allocation6 + $0x28] sm:$0xff] }
 0x2b3   :  { %2716 = vmatpush3.bf16.msra.mxu0 %v3432_v38  ;;  %v1725_v38 = vld [vmem:[#allocation6 + $0x30] sm:$0xff] }
 0x2b4   :  { %2718 = vmatprep.subr.bf16.mxu0 %v3438_v57 }
 0x2b7   :  { %2720 = vmatpush3.bf16.msra.mxu0 %v3444_v47  ;;  %v1730_v47 = vld [vmem:[#allocation6 + $0x58] sm:$0xff] }
 0x2b8   :  { %2722 = vmatprep.subr.bf16.mxu0 %v3450_v3  ;;  %v1731_v3 = vld [vmem:[#allocation6 + $0x60] sm:$0xff] }
 0x2b9   :  { %v2776_v58 = vpack.c.bf16 %v1732_v7, %v1731_v3 }
 0x2bb   :  { %2724 = vmatpush3.bf16.msra.mxu0 %v3456_v34  ;;  %v1733_v34 = vld [vmem:[#allocation6 + $0x70] sm:$0xff] }
 0x2bc   :  { %2757 = vmatprep.subr.bf16.mxu0 %v2890_v0 }
 0x2d7   :  { %v1070_v15 = vpop.f32.mrb[2].mxu0 }
 0x2d8   :  { %v2785_v39 = vadd.f32 %v1070_v15, %v3475_v61  ;;  %v1072_v50 = vpop.f32.mrb[3].mxu0 }
 0x2d9   :  { %v2786_v51 = vadd.f32 %v1072_v50, %v3477_v12  ;;  %v1833_v50 = vld [vmem:[%s3576_s8] ss:$0 sm:$0xff] }
 0x2da   :  { %v1075_v37 = vmax.f32 %v2785_v39, 0.0 }
 0x2db   :  { %v1076_v18 = vmax.f32 %v2786_v51, 0.0  ;;  %v1214_v36 = vpop.f32.mrb[14].mxu1 }
 0x2dc   :  { %v1216_v6 = vpop.f32.mrb[15].mxu1 }
 0x2dd   :  { %v2788_v60 = vadd.f32 %v1216_v6, %v3477_v12  ;;  %1567 = vmatprep.mubr.f32.mxu1 %v1076_v18  ;;  %1638 = vmatprep.mubr.f32.mxu0 %v1076_v18 }
 0x2de   :  { %1568 = vmatmul.mubr.f32.vlgmr.msra.gmra.mrb[18].mxu1 %v1075_v37  ;;  %1639 = vmatmul.mubr.f32.vlgmr.msra.gmra.mrb[8].mxu0 %v1075_v37 }
 0x2df   :  { %v1220_v30 = vmax.f32 %v2788_v60, 0.0  ;;  %2728 = vmatpush3.bf16.msra.mxu1 %v3386_v25  ;;  %2154 = vmatprep.mubr.msk.f32.mxu0 %vm2891_vm0, %v2892_v1  ;;  %v2787_v1 = vadd.f32 %v1214_v36, %v3475_v61 }
 0x2e0   :  { %2730 = vmatprep.subr.bf16.mxu1 %v3392_v41  ;;  %v1719_v41 = vld [vmem:[#allocation6] sm:$0xff] }
 0x2e1   :  { %1708 = vmatprep.mubr.f32.mxu1 %v1220_v30  ;;  %v1219_v25 = vmax.f32 %v2787_v1, 0.0 }
 0x2e3   :  { %2732 = vmatpush3.bf16.msra.mxu1 %v3398_v43  ;;  %v1720_v43 = vld [vmem:[#allocation6 + $0x8] sm:$0xff] }
 0x2e4   :  { %2734 = vmatprep.subr.bf16.mxu1 %v3404_v16  ;;  %v1721_v16 = vld [vmem:[#allocation6 + $0x10] sm:$0xff] }
 0x2e7   :  { %2736 = vmatpush3.bf16.msra.mxu1 %v3410_v22  ;;  %v2758_v22 = vpack.c.bf16 %v1720_v43, %v1719_v41 }
 0x2e8   :  { %2738 = vmatprep.subr.bf16.mxu1 %v3416_v31  ;;  %v1722_v31 = vld [vmem:[#allocation6 + $0x18] sm:$0xff] }
 0x2e9   :  { %2759 = vmatpush3.bf16.msra.mxu0 %v2758_v22  ;;  %v2761_v5 = vpack.c.bf16 %v1722_v31, %v1721_v16 }
 0x2ea   :  { %2760 = vmatprep.subr.bf16.mxu0 %v2890_v0 }
 0x2eb   :  { %2740 = vmatpush3.bf16.msra.mxu1 %v3422_v11  ;;  %v1723_v11 = vld [vmem:[#allocation6 + $0x20] sm:$0xff] }
 0x2ec   :  { %2742 = vmatprep.subr.bf16.mxu1 %v3428_v14  ;;  %v2764_v14 = vpack.c.bf16 %v1724_v10, %v1723_v11 }
 0x2ed   :  { %2762 = vmatpush3.bf16.msra.mxu0 %v2761_v5 }
 0x2ee   :  { %2763 = vmatprep.subr.bf16.mxu0 %v2890_v0 }
 0x2ef   :  { %2744 = vmatpush3.bf16.msra.mxu1 %v3434_v44  ;;  %v1726_v44 = vld [vmem:[#allocation6 + $0x38] sm:$0xff] }
 0x2f0   :  { %2746 = vmatprep.subr.bf16.mxu1 %v3440_v62  ;;  %v2767_v57 = vpack.c.bf16 %v1726_v44, %v1725_v38  ;;  %v1727_v62 = vld [vmem:[#allocation6 + $0x40] sm:$0xff] }
 0x2f1   :  { %2765 = vmatpush3.bf16.msra.mxu0 %v2764_v14  ;;  %v2770_v28 = vpack.c.bf16 %v1728_v17, %v1727_v62 }
 0x2f2   :  { %2766 = vmatprep.subr.bf16.mxu0 %v2890_v0 }
 0x2f3   :  { %2748 = vmatpush3.bf16.msra.mxu1 %v3446_v49  ;;  %v2773_v49 = vpack.c.bf16 %v1730_v47, %v1729_v35 }
 0x2f4   :  { %2750 = vmatprep.subr.bf16.mxu1 %v3452_v13 }
 0x2f5   :  { %2768 = vmatpush3.bf16.msra.mxu0 %v2767_v57 }
 0x2f6   :  { %2769 = vmatprep.subr.bf16.mxu0 %v2890_v0 }
 0x2f7   :  { %2752 = vmatpush3.bf16.msra.mxu1 %v3458_v40  ;;  %v1734_v40 = vld [vmem:[#allocation6 + $0x78] sm:$0xff] }
 0x2f8   :  { %2754 = vmatprep.subr.bf16.mxu1 %v3462_v48  ;;  %v2779_v55 = vpack.c.bf16 %v1734_v40, %v1733_v34 }
 0x2f9   :  { %2771 = vmatpush3.bf16.msra.mxu0 %v2770_v28 }
 0x2fa   :  { %2772 = vmatprep.subr.bf16.mxu0 %v2890_v0 }
 0x2fb   :  { %2756 = vmatpush3.bf16.msra.mxu1 %v3466_v29 }
 0x2fd   :  { %2774 = vmatpush3.bf16.msra.mxu0 %v2773_v49 }
 0x2fe   :  { %1709 = vmatmul.mubr.f32.vlgmr.msra.gmra.mrb[20].mxu1 %v1219_v25  ;;  %2775 = vmatprep.subr.bf16.mxu0 %v2890_v0 }
 0x301   :  { %2777 = vmatpush3.bf16.msra.mxu0 %v2776_v58 }
 0x302   :  { %2778 = vmatprep.subr.bf16.mxu0 %v2890_v0 }
 0x305   :  { %2780 = vmatpush3.bf16.msra.mxu0 %v2779_v55 }
 0x351   :  { %v1885_v59 = vpop.f32.mrb[4].mxu0 }
 0x352   :  { %v1886_v13 = vpop.f32.mrb[5].mxu0 }
 0x353   :  { %v1887_v2 = vadd.f32 %v1886_v13, %v1885_v59 }
 0x355   :  { %v1920_v24 = vpop.f32.mrb[16].mxu1  ;;  %v1359_v23 = vadd.f32 %v1887_v2, %v1832_v19 }
 0x356   :  { %v1921_v48 = vpop.f32.mrb[17].mxu1 }
 0x357   :  { %v1922_v29 = vadd.f32 %v1921_v48, %v1920_v24 }
 0x359   :  { %v1429_v42 = vadd.f32 %v1922_v29, %v1359_v23 }
 0x35b   :  { %v1432_v0 = vmax.f32 %v1429_v42, 0.0 }
 0x371   :  { %v1955_v46 = vpop.f32.mrb[6].mxu0 }
 0x372   :  { %v1956_v52 = vpop.f32.mrb[7].mxu0 }
 0x373   :  { %v1957_v53 = vadd.f32 %v1956_v52, %v1955_v46 }
 0x375   :  { %v1500_v20 = vadd.f32 %v1957_v53, %v1832_v19 }
 0x3b1   :  { %v1990_v54 = vpop.f32.mrb[18].mxu1  ;;  %v2025_v61 = vpop.f32.mrb[8].mxu0 }
 0x3b2   :  { %v1991_v12 = vpop.f32.mrb[19].mxu1  ;;  %v2026_v4 = vpop.f32.mrb[9].mxu0 }
 0x3b3   :  { %v1992_v21 = vadd.f32 %v1991_v12, %v1990_v54  ;;  %v2027_v26 = vadd.f32 %v2026_v4, %v2025_v61 }
 0x3b5   :  { %v1570_v27 = vadd.f32 %v1992_v21, %v1500_v20  ;;  %v1641_v63 = vadd.f32 %v2027_v26, %v1832_v19 }
 0x3b7   :  { %v1573_v32 = vmax.f32 %v1570_v27, 0.0 }
 0x3b9   :  { %v1715_v33 = vadd.f32 %v1573_v32, %v1432_v0 }
 0x3d1   :  { %v2060_v45 = vpop.f32.mrb[20].mxu1 }
 0x3d2   :  { %v2061_v56 = vpop.f32.mrb[21].mxu1 }
 0x3d3   :  { %v2062_v8 = vadd.f32 %v2061_v56, %v2060_v45 }
 0x3d5   :  { %v1711_v9 = vadd.f32 %v2062_v8, %v1641_v63 }
 0x3d7   :  { %v1714_v15 = vmax.f32 %v1711_v9, 0.0 }
 0x3d9   :  { %v1716_v39 = vadd.f32 %v1715_v33, %v1714_v15 }
 0x3db   :  { %2155 = vmatmul.mubr.msk.f32.vlgmr.msra.gmra.mrb[10].mxu0 %vm1717_vm5, %v1716_v39 }
 0x4ae   :  { %v1808_v51 = vpop.f32.mrb[10].mxu0 }
 0x4af   :  { %v1809_v18 = vadd.f32 %v1833_v50, %v1808_v51  ;;  %v2156_v36 = vpop.f32.mrb[11].mxu0 }
 0x4b1   :  { %1812 = vst [vmem:[%s3577_s9] sm:$0xff] %v1809_v18 }
 0x4b2   :  { %1817 = vsyncpa [#allocation3], 1 }
 0x4b3   :  { %1818 = vsyncpa [#allocation5], 1 }

</bundles_post_ra>
